<compile_context>
chip_gen: v5e
topology: v5e:2x2
jax: 0.10.0
libtpu: 0.0.40
codegen_flags: <defaults>
</compile_context>

<pallas_src>
import jax
import jax.numpy as jnp
from jax.experimental import pallas as pl
from jax.experimental.pallas import tpu as pltpu


# -----------------------------------------------------------------------------
# Pass 1: LayerNorm -> Linear1 (+ per-tile partial BatchNorm statistics)
# -----------------------------------------------------------------------------
def _ln_linear1_kernel(x_ref, w1_ref, h_ref, stats_ref):
    x = x_ref[...].astype(jnp.float32)

    # LayerNorm (eps=1e-5), centered two-pass moments (better conditioned than
    # E[x^2] - mu^2 for the per-row statistics).
    mu = jnp.mean(x, axis=-1, keepdims=True)
    xc = x - mu
    var = jnp.mean(xc * xc, axis=-1, keepdims=True)
    xn = xc * jax.lax.rsqrt(var + 1e-5)
    # ln_g is folded into w1 rows at param-prep time; ln_b and b1 are
    # batch-constant shifts of h that cancel exactly through training-mode
    # BatchNorm, so they are dropped from the kernel.

    # Linear1 on the MXU: bf16 operands, f32 accumulation.
    h = jnp.dot(xn.astype(jnp.bfloat16), w1_ref[...],
                preferred_element_type=jnp.float32)

    # bf16 intermediate -> halves the h HBM write+read round trip.
    h_ref[...] = h.astype(h_ref.dtype)

    # Per-tile partial BatchNorm statistics (f32): row 0 = sum, row 1 = sum of
    # squares. Partial sublane stores; remaining rows of the (8, H) block are
    # never read by the wrapper.
    stats_ref[0:1, :] = jnp.sum(h, axis=0, keepdims=True)
    stats_ref[1:2, :] = jnp.sum(h * h, axis=0, keepdims=True)


# -----------------------------------------------------------------------------
# Pass 2: BatchNorm (folded scale/shift) -> ReLU -> Linear2 -> L2 normalize
# -----------------------------------------------------------------------------
def _bn_relu_linear2_norm_kernel(h_ref, bn_scale_ref, bn_shift_ref,
                                 w2_ref, b2_ref, out_ref):
    h = h_ref[...].astype(jnp.float32)
    hn = jnp.maximum(h * bn_scale_ref[...] + bn_shift_ref[...], 0.0)

    # Linear2 on the MXU: bf16 operands, f32 accumulation.
    z = jnp.dot(hn.astype(jnp.bfloat16), w2_ref[...],
                preferred_element_type=jnp.float32) + b2_ref[...]

    # F.normalize(dim=1): z / max(||z||, 1e-12) == z * rsqrt(max(||z||^2, 1e-24))
    ss = jnp.sum(z * z, axis=-1, keepdims=True)
    out_ref[...] = (z * jax.lax.rsqrt(jnp.maximum(ss, 1e-24))).astype(out_ref.dtype)


# -----------------------------------------------------------------------------
# Helpers
# -----------------------------------------------------------------------------
def _pick_batch_tile(b):
    """Batch tile: multiple of 8 (prefer 16 for bf16 sublane packing), divides
    B, and gives nt >= 4 when possible so the pipeline overlaps DMA/compute and
    both v7x TensorCores are used. Capped at 512 rows."""
    assert b % 8 == 0, "batch must be a multiple of 8"
    target = min(512, max(8, b // 4))
    for step in (16, 8):
        t = (target // step) * step
        while t >= step:
            if b % t == 0:
                return t
            t -= step
    return 8


def _vmem_limit_bytes():
    """Generation-aware VMEM scoped limit (~60% of physical, v7x-safe fallback)."""
    cap = 64 * 1024 * 1024  # conservative: v7x has 64 MiB / TensorCore
    try:
        info = pltpu.get_tpu_info()
        cap = int(getattr(info, "vmem_capacity_bytes", cap))
    except Exception:
        pass
    return max(16 * 1024 * 1024, min(int(cap * 0.6), 100 * 1024 * 1024))


def _const_spec(shape):
    """Grid-invariant operand: constant index map + single VMEM buffer (the
    default double-buffer would never be re-fetched, so it is pure waste)."""
    idx = lambda i: (0, 0)
    try:
        return pl.BlockSpec(shape, idx, pipeline_mode=pl.Buffered(1))
    except Exception:  # older jax without pipeline_mode / Buffered
        return pl.BlockSpec(shape, idx)


# -----------------------------------------------------------------------------
# Wrapper
# -----------------------------------------------------------------------------
@jax.jit
def projection_head(x, kparams):
    """x: (B, D) float32, kparams from prepare_params.
    Returns (B, O) float32 with L2-normalized rows."""
    B, D = x.shape
    H = kparams["w1"].shape[1]
    O = kparams["w2"].shape[1]
    # 128-multiples fill the v5e MXU; multiples of 256 are preferred on
    # v6e/v7x (256x256 MXU) when the model allows.
    assert D % 128 == 0 and H % 128 == 0 and O % 128 == 0, \
        "feature dims must be multiples of 128 (lane-dense MXU tiles)"
    TB = _pick_batch_tile(B)
    nt = B // TB

    row = lambda i: (i, 0)  # batch-tiled arrays
    cparams = pltpu.CompilerParams(
        dimension_semantics=("parallel",),
        vmem_limit_bytes=_vmem_limit_bytes())

    # ---- Pass 1: LayerNorm -> Linear1 + partial BN stats -------------------
    h, stats = pl.pallas_call(
        _ln_linear1_kernel,
        grid=(nt,),
        in_specs=[
            pl.BlockSpec((TB, D), row),   # x tile (double-buffered)
            _const_spec((D, H)),          # folded w1 (bf16, resident, 1 buffer)
        ],
        out_specs=(
            pl.BlockSpec((TB, H), row),   # h tile (bf16)
            pl.BlockSpec((8, H), row),    # per-tile stats block
        ),
        out_shape=(
            jax.ShapeDtypeStruct((B, H), jnp.bfloat16),
            jax.ShapeDtypeStruct((nt * 8, H), jnp.float32),
        ),
        compiler_params=cparams,
        cost_estimate=pl.CostEstimate(
            flops=2 * B * D * H + 7 * B * D,
            transcendentals=B,
            bytes_accessed=4 * B * D + 2 * D * H + 2 * B * H + 4 * 8 * nt * H),
    )(x, kparams["w1"])

    # ---- BatchNorm1d batch statistics (training mode: biased variance) -----
    # NOTE: sum / sum-of-squares in f32 with a >=0 clamp; fine for post-LN
    # activations, but large-mean features would prefer a centered pass.
    stats = stats.reshape(nt, 8, H)
    bsum = jnp.sum(stats[:, 0, :], axis=0)
    bsumsq = jnp.sum(stats[:, 1, :], axis=0)
    bmean = bsum / B
    bvar = jnp.maximum(bsumsq / B - bmean * bmean, 0.0)
    inv_std = jax.lax.rsqrt(bvar + 1e-5)
    bn_scale = (kparams["bn_g"] * inv_std).astype(jnp.float32)                  # (1, H)
    bn_shift = (kparams["bn_b"] - kparams["bn_g"] * bmean * inv_std).astype(jnp.float32)

    # ---- Pass 2: BN -> ReLU -> Linear2 -> L2 normalize ----------------------
    out = pl.pallas_call(
        _bn_relu_linear2_norm_kernel,
        grid=(nt,),
        in_specs=[
            pl.BlockSpec((TB, H), row),   # h tile (bf16, double-buffered)
            _const_spec((1, H)),          # BN scale
            _const_spec((1, H)),          # BN shift
            _const_spec((H, O)),          # w2 (bf16, resident, 1 buffer)
            _const_spec((1, O)),          # b2
        ],
        out_specs=pl.BlockSpec((TB, O), row),
        out_shape=jax.ShapeDtypeStruct((B, O), jnp.float32),
        compiler_params=cparams,
        cost_estimate=pl.CostEstimate(
            flops=2 * B * H * O + 5 * B * H + 3 * B * O,
            transcendentals=B,
            bytes_accessed=2 * B * H + 2 * H * O + 4 * B * O + 8 * H + 4 * O),
    )(h, bn_scale, bn_shift, kparams["w2"], kparams["b2"])
    return out


# -----------------------------------------------------------------------------
# Parameters
# -----------------------------------------------------------------------------
def init_params(key, input_dim, hidden_dim, output_dim):
    """Deterministic synthetic parameter init (PyTorch-equivalent f32 params)."""
    ks = jax.random.split(key, 8)
    ln_g = 1.0 + 0.1 * jax.random.normal(ks[0], (1, input_dim), jnp.float32)
    ln_b = 0.1 * jax.random.normal(ks[1], (1, input_dim), jnp.float32)
    # Linear weights stored transposed (in, out).
    w1 = jax.random.normal(ks[2], (input_dim, hidden_dim), jnp.float32) / jnp.sqrt(input_dim)
    b1 = 0.1 * jax.random.normal(ks[3], (1, hidden_dim), jnp.float32)
    bn_g = 1.0 + 0.1 * jax.random.normal(ks[4], (1, hidden_dim), jnp.float32)
    bn_b = 0.1 * jax.random.normal(ks[5], (1, hidden_dim), jnp.float32)
    w2 = jax.random.normal(ks[6], (hidden_dim, output_dim), jnp.float32) / jnp.sqrt(hidden_dim)
    b2 = 0.1 * jax.random.normal(ks[7], (1, output_dim), jnp.float32)
    return dict(ln_g=ln_g, ln_b=ln_b, w1=w1, b1=b1,
                bn_g=bn_g, bn_b=bn_b, w2=w2, b2=b2)


def prepare_params(params):
    """Kernel-ready params: fold ln_g into w1 rows, drop ln_b/b1 (batch-constant
    shifts cancel exactly through training-mode BatchNorm), cast MXU weights to
    bf16. Done once at param-prep time, not per grid step.
    NOTE: exact for batch-stat BN; an eval-mode / running-stats path would need
    ln_b and b1 back."""
    ln_g = params["ln_g"].reshape(-1, 1).astype(jnp.float32)          # (D, 1)
    w1f = (ln_g * params["w1"].astype(jnp.float32)).astype(jnp.bfloat16)
    return dict(
        w1=w1f,                                                        # (D, H) bf16
        bn_g=params["bn_g"].reshape(1, -1).astype(jnp.float32),        # (1, H)
        bn_b=params["bn_b"].reshape(1, -1).astype(jnp.float32),        # (1, H)
        w2=params["w2"].astype(jnp.bfloat16),                          # (H, O) bf16
        b2=params["b2"].reshape(1, -1).astype(jnp.float32),            # (1, O)
    )


# -----------------------------------------------------------------------------
# Pure-JAX f32 reference of the PyTorch module (training-mode BN)
# -----------------------------------------------------------------------------
def _reference(x, params):
    xf = x.astype(jnp.float32)
    mu = jnp.mean(xf, axis=-1, keepdims=True)
    var = jnp.mean((xf - mu) ** 2, axis=-1, keepdims=True)
    xn = (xf - mu) / jnp.sqrt(var + 1e-5) * params["ln_g"] + params["ln_b"]
    h = xn @ params["w1"] + params["b1"]
    bmu = jnp.mean(h, axis=0, keepdims=True)
    bvar = jnp.mean((h - bmu) ** 2, axis=0, keepdims=True)
    hn = (h - bmu) / jnp.sqrt(bvar + 1e-5) * params["bn_g"] + params["bn_b"]
    hn = jnp.maximum(hn, 0.0)
    z = hn @ params["w2"] + params["b2"]
    n = jnp.maximum(jnp.linalg.norm(z, axis=1, keepdims=True), 1e-12)
    return z / n
    # TODO(synk): nn.BatchNorm1d running-mean/var buffer updates (training-time
    # side effect) are not reproduced; only the forward output is.


if __name__ == "__main__":
    # Small but lane-dense / MXU-aligned sizes (feature dims multiples of 128).
    # B=256 with TB=64 gives nt=4 tiles: pipelining + v7x 2-TC sharding.
    B, INPUT_DIM, HIDDEN_DIM, OUTPUT_DIM = 256, 128, 256, 128

    key = jax.random.PRNGKey(0)
    kx, kp = jax.random.split(key)
    x = jax.random.normal(kx, (B, INPUT_DIM), jnp.float32)
    params = init_params(kp, INPUT_DIM, HIDDEN_DIM, OUTPUT_DIM)
    kparams = prepare_params(params)

    out = jax.block_until_ready(projection_head(x, kparams))

    assert out.shape == (B, OUTPUT_DIM)
    assert bool(jnp.all(jnp.isfinite(out)))
    # Rows should be (approximately) unit-norm after F.normalize(dim=1).
    row_norms = jnp.linalg.norm(out, axis=1)
    assert bool(jnp.all(jnp.abs(row_norms - 1.0) < 1e-3))
    # Loose check against the f32 reference (kernel uses bf16 MXU operands and
    # a bf16 intermediate h).
    ref = _reference(x, params)
    max_err = jnp.max(jnp.abs(out - ref))
    assert bool(max_err < 5e-2), f"max abs err vs reference: {max_err}"

    print("KERNEL_OK")
</pallas_src>

<mosaic_0001>
module attributes {stable_mosaic.version = 11 : i64} {
  func.func @_ln_linear1_kernel(%arg0: i32, %arg1: memref<64x128xf32, #tpu.memory_space<vmem>>, %arg2: memref<128x256xbf16, #tpu.memory_space<vmem>>, %arg3: memref<64x256xbf16, #tpu.memory_space<vmem>>, %arg4: memref<8x256xf32, #tpu.memory_space<vmem>>) attributes {dimension_semantics = [#tpu.dimension_semantics<parallel>], iteration_bounds = array<i64: 4>, scalar_prefetch = 0 : i64, scratch_operands = 0 : i64, tpu.core_type = #tpu.core_type<tc>, window_params = [{transform_indices = @transform_0, window_bounds = array<i64: 64, 128>}, {pipeline_mode = #tpu.pipeline_mode<synchronous>, transform_indices = @transform_1, window_bounds = array<i64: 128, 256>}, {transform_indices = @transform_2, window_bounds = array<i64: 64, 256>}, {transform_indices = @transform_3, window_bounds = array<i64: 8, 256>}]} {
    %c0 = arith.constant 0 : index
    %c0_0 = arith.constant 0 : index
    %0 = vector.load %arg1[%c0, %c0_0] : memref<64x128xf32, #tpu.memory_space<vmem>>, vector<64x128xf32>
    %cst = arith.constant dense<0.000000e+00> : vector<64xf32>
    %1 = vector.multi_reduction <add>, %0, %cst [1] : vector<64x128xf32> to vector<64xf32>
    %2 = vector.shape_cast %1 : vector<64xf32> to vector<64x1xf32>
    %cst_1 = arith.constant 1.280000e+02 : f32
    %3 = vector.broadcast %cst_1 : f32 to vector<64x1xf32>
    %4 = arith.divf %2, %3 : vector<64x1xf32>
    %5 = vector.broadcast %4 : vector<64x1xf32> to vector<64x128xf32>
    %6 = arith.subf %0, %5 : vector<64x128xf32>
    %7 = arith.mulf %6, %6 : vector<64x128xf32>
    %cst_2 = arith.constant dense<0.000000e+00> : vector<64xf32>
    %8 = vector.multi_reduction <add>, %7, %cst_2 [1] : vector<64x128xf32> to vector<64xf32>
    %9 = vector.shape_cast %8 : vector<64xf32> to vector<64x1xf32>
    %cst_3 = arith.constant 1.280000e+02 : f32
    %10 = vector.broadcast %cst_3 : f32 to vector<64x1xf32>
    %11 = arith.divf %9, %10 : vector<64x1xf32>
    %cst_4 = arith.constant 9.99999974E-6 : f32
    %12 = vector.broadcast %cst_4 : f32 to vector<64x1xf32>
    %13 = arith.addf %11, %12 : vector<64x1xf32>
    %14 = math.rsqrt %13 : vector<64x1xf32>
    %15 = vector.broadcast %14 : vector<64x1xf32> to vector<64x128xf32>
    %16 = arith.mulf %6, %15 : vector<64x128xf32>
    %17 = arith.truncf %16 : vector<64x128xf32> to vector<64x128xbf16>
    %c0_5 = arith.constant 0 : index
    %c0_6 = arith.constant 0 : index
    %18 = vector.load %arg2[%c0_5, %c0_6] : memref<128x256xbf16, #tpu.memory_space<vmem>>, vector<128x256xbf16>
    %cst_7 = arith.constant dense<0.000000e+00> : vector<64x256xf32>
    %19 = tpu.matmul %17, %18, %cst_7 {dimension_numbers = #tpu.dot_dimension_numbers<[1], [0], [0], [1], [0, 0, 1, 1], [], []>} : vector<64x128xbf16>, vector<128x256xbf16>, vector<64x256xf32> -> vector<64x256xf32>
    %20 = arith.truncf %19 : vector<64x256xf32> to vector<64x256xbf16>
    %c0_8 = arith.constant 0 : index
    %c0_9 = arith.constant 0 : index
    %21 = vector.load %arg3[%c0_8, %c0_9] : memref<64x256xbf16, #tpu.memory_space<vmem>>, vector<64x256xbf16>
    tpu.vector_store %arg3[%c0_8, %c0_9], %20 {strides = array<i32>} : memref<64x256xbf16, #tpu.memory_space<vmem>>, vector<64x256xbf16>,
    %cst_10 = arith.constant dense<0.000000e+00> : vector<256xf32>
    %22 = vector.multi_reduction <add>, %19, %cst_10 [0] : vector<64x256xf32> to vector<256xf32>
    %23 = vector.shape_cast %22 : vector<256xf32> to vector<1x256xf32>
    %c0_11 = arith.constant 0 : index
    %c0_12 = arith.constant 0 : index
    %24 = vector.load %arg4[%c0_11, %c0_12] : memref<8x256xf32, #tpu.memory_space<vmem>>, vector<1x256xf32>
    tpu.vector_store %arg4[%c0_11, %c0_12], %23 {strides = array<i32>} : memref<8x256xf32, #tpu.memory_space<vmem>>, vector<1x256xf32>,
    %25 = arith.mulf %19, %19 : vector<64x256xf32>
    %cst_13 = arith.constant dense<0.000000e+00> : vector<256xf32>
    %26 = vector.multi_reduction <add>, %25, %cst_13 [0] : vector<64x256xf32> to vector<256xf32>
    %27 = vector.shape_cast %26 : vector<256xf32> to vector<1x256xf32>
    %c1 = arith.constant 1 : index
    %c0_14 = arith.constant 0 : index
    %28 = vector.load %arg4[%c1, %c0_14] : memref<8x256xf32, #tpu.memory_space<vmem>>, vector<1x256xf32>
    tpu.vector_store %arg4[%c1, %c0_14], %27 {strides = array<i32>} : memref<8x256xf32, #tpu.memory_space<vmem>>, vector<1x256xf32>,
    return
  }
  func.func @transform_0(%arg0: i32) -> (i32, i32) {
    %c0_i32 = arith.constant 0 : i32
    %c0_i32_0 = arith.constant 0 : i32
    return %arg0, %c0_i32 : i32, i32
  }
  func.func @transform_1(%arg0: i32) -> (i32, i32) {
    %c0_i32 = arith.constant 0 : i32
    %c0_i32_0 = arith.constant 0 : i32
    %c0_i32_1 = arith.constant 0 : i32
    return %c0_i32, %c0_i32_0 : i32, i32
  }
  func.func @transform_2(%arg0: i32) -> (i32, i32) {
    %c0_i32 = arith.constant 0 : i32
    %c0_i32_0 = arith.constant 0 : i32
    return %arg0, %c0_i32 : i32, i32
  }
  func.func @transform_3(%arg0: i32) -> (i32, i32) {
    %c0_i32 = arith.constant 0 : i32
    %c0_i32_0 = arith.constant 0 : i32
    return %arg0, %c0_i32 : i32, i32
  }
}

module attributes {stable_mosaic.version = 11 : i64} {
  func.func @_bn_relu_linear2_norm_kernel(%arg0: i32, %arg1: memref<64x256xbf16, #tpu.memory_space<vmem>>, %arg2: memref<1x256xf32, #tpu.memory_space<vmem>>, %arg3: memref<1x256xf32, #tpu.memory_space<vmem>>, %arg4: memref<256x128xbf16, #tpu.memory_space<vmem>>, %arg5: memref<1x128xf32, #tpu.memory_space<vmem>>, %arg6: memref<64x128xf32, #tpu.memory_space<vmem>>) attributes {dimension_semantics = [#tpu.dimension_semantics<parallel>], iteration_bounds = array<i64: 4>, scalar_prefetch = 0 : i64, scratch_operands = 0 : i64, tpu.core_type = #tpu.core_type<tc>, window_params = [{transform_indices = @transform_0, window_bounds = array<i64: 64, 256>}, {pipeline_mode = #tpu.pipeline_mode<synchronous>, transform_indices = @transform_1, window_bounds = array<i64: 1, 256>}, {pipeline_mode = #tpu.pipeline_mode<synchronous>, transform_indices = @transform_2, window_bounds = array<i64: 1, 256>}, {pipeline_mode = #tpu.pipeline_mode<synchronous>, transform_indices = @transform_3, window_bounds = array<i64: 256, 128>}, {pipeline_mode = #tpu.pipeline_mode<synchronous>, transform_indices = @transform_4, window_bounds = array<i64: 1, 128>}, {transform_indices = @transform_5, window_bounds = array<i64: 64, 128>}]} {
    %c0 = arith.constant 0 : index
    %c0_0 = arith.constant 0 : index
    %0 = vector.load %arg1[%c0, %c0_0] : memref<64x256xbf16, #tpu.memory_space<vmem>>, vector<64x256xbf16>
    %1 = arith.extf %0 : vector<64x256xbf16> to vector<64x256xf32>
    %c0_1 = arith.constant 0 : index
    %c0_2 = arith.constant 0 : index
    %2 = vector.load %arg2[%c0_1, %c0_2] : memref<1x256xf32, #tpu.memory_space<vmem>>, vector<1x256xf32>
    %3 = vector.broadcast %2 : vector<1x256xf32> to vector<64x256xf32>
    %4 = arith.mulf %1, %3 : vector<64x256xf32>
    %c0_3 = arith.constant 0 : index
    %c0_4 = arith.constant 0 : index
    %5 = vector.load %arg3[%c0_3, %c0_4] : memref<1x256xf32, #tpu.memory_space<vmem>>, vector<1x256xf32>
    %6 = vector.broadcast %5 : vector<1x256xf32> to vector<64x256xf32>
    %7 = arith.addf %4, %6 : vector<64x256xf32>
    %cst = arith.constant 0.000000e+00 : f32
    %8 = vector.broadcast %cst : f32 to vector<64x256xf32>
    %9 = arith.maximumf %7, %8 : vector<64x256xf32>
    %10 = arith.truncf %9 : vector<64x256xf32> to vector<64x256xbf16>
    %c0_5 = arith.constant 0 : index
    %c0_6 = arith.constant 0 : index
    %11 = vector.load %arg4[%c0_5, %c0_6] : memref<256x128xbf16, #tpu.memory_space<vmem>>, vector<256x128xbf16>
    %cst_7 = arith.constant dense<0.000000e+00> : vector<64x128xf32>
    %12 = tpu.matmul %10, %11, %cst_7 {dimension_numbers = #tpu.dot_dimension_numbers<[1], [0], [0], [1], [0, 0, 1, 1], [], []>} : vector<64x256xbf16>, vector<256x128xbf16>, vector<64x128xf32> -> vector<64x128xf32>
    %c0_8 = arith.constant 0 : index
    %c0_9 = arith.constant 0 : index
    %13 = vector.load %arg5[%c0_8, %c0_9] : memref<1x128xf32, #tpu.memory_space<vmem>>, vector<1x128xf32>
    %14 = vector.broadcast %13 : vector<1x128xf32> to vector<64x128xf32>
    %15 = arith.addf %12, %14 : vector<64x128xf32>
    %16 = arith.mulf %15, %15 : vector<64x128xf32>
    %cst_10 = arith.constant dense<0.000000e+00> : vector<64xf32>
    %17 = vector.multi_reduction <add>, %16, %cst_10 [1] : vector<64x128xf32> to vector<64xf32>
    %18 = vector.shape_cast %17 : vector<64xf32> to vector<64x1xf32>
    %cst_11 = arith.constant 1.000000e-24 : f32
    %19 = vector.broadcast %cst_11 : f32 to vector<64x1xf32>
    %20 = arith.maximumf %18, %19 : vector<64x1xf32>
    %21 = math.rsqrt %20 : vector<64x1xf32>
    %22 = vector.broadcast %21 : vector<64x1xf32> to vector<64x128xf32>
    %23 = arith.mulf %15, %22 : vector<64x128xf32>
    %c0_12 = arith.constant 0 : index
    %c0_13 = arith.constant 0 : index
    %24 = vector.load %arg6[%c0_12, %c0_13] : memref<64x128xf32, #tpu.memory_space<vmem>>, vector<64x128xf32>
    tpu.vector_store %arg6[%c0_12, %c0_13], %23 {strides = array<i32>} : memref<64x128xf32, #tpu.memory_space<vmem>>, vector<64x128xf32>,
    return
  }
  func.func @transform_0(%arg0: i32) -> (i32, i32) {
    %c0_i32 = arith.constant 0 : i32
    %c0_i32_0 = arith.constant 0 : i32
    return %arg0, %c0_i32 : i32, i32
  }
  func.func @transform_1(%arg0: i32) -> (i32, i32) {
    %c0_i32 = arith.constant 0 : i32
    %c0_i32_0 = arith.constant 0 : i32
    %c0_i32_1 = arith.constant 0 : i32
    return %c0_i32, %c0_i32_0 : i32, i32
  }
  func.func @transform_2(%arg0: i32) -> (i32, i32) {
    %c0_i32 = arith.constant 0 : i32
    %c0_i32_0 = arith.constant 0 : i32
    %c0_i32_1 = arith.constant 0 : i32
    return %c0_i32, %c0_i32_0 : i32, i32
  }
  func.func @transform_3(%arg0: i32) -> (i32, i32) {
    %c0_i32 = arith.constant 0 : i32
    %c0_i32_0 = arith.constant 0 : i32
    %c0_i32_1 = arith.constant 0 : i32
    return %c0_i32, %c0_i32_0 : i32, i32
  }
  func.func @transform_4(%arg0: i32) -> (i32, i32) {
    %c0_i32 = arith.constant 0 : i32
    %c0_i32_0 = arith.constant 0 : i32
    %c0_i32_1 = arith.constant 0 : i32
    return %c0_i32, %c0_i32_0 : i32, i32
  }
  func.func @transform_5(%arg0: i32) -> (i32, i32) {
    %c0_i32 = arith.constant 0 : i32
    %c0_i32_0 = arith.constant 0 : i32
    return %arg0, %c0_i32 : i32, i32
  }
}

</mosaic_0001>

<bundles_post_ra>
// kernel: projection_head.2
= control target key start
LH: loop header
LB: loop body
LE: loop exit
PB: predicated region body
PF: predicated region fallthrough
CT: control target
= control target key end

     0   :  { %9 = vsyncpa [#allocation3], 0  ;;  %s1334_s0 = inlined_call_operand.hbm [shape: f32[256,128], index: 0, kind: input, shape index: {}]   ;;  %s1335_s1 = inlined_call_operand.hbm [shape: bf16[128,256], index: 1, kind: input, shape index: {}]   ;;  %s1336_s2 = inlined_call_operand.vmem [shape: bf16[256,256], index: 2, kind: output, shape index: {0}]   ;;  %s1337_s3 = inlined_call_operand.vmem [shape: f32[32,256], index: 3, kind: output, shape index: {1}]  }
   0x1   :  { %11 = vsyncpa [#allocation3 + $0x1], 0 }
   0x2   :  { %12 = vsyncpa [#allocation5], 0  ;;  %s1089_s12 = smov 0   ;;  %s1091_s13 = smov 0  }
   0x3   :  { %s1093_s14 = smov 0   ;;  %s1095_s15 = smov 0  }
   0x4 LB: > { %s1108_s16 = sadd.s32 4294967295, %s1063_s15   ;;  %p38_p0 = scmp.ne.s32.totalorder %s1055_s13, %s1051_s12  ;;  %s1063_s15 = sphi %s1095_s15, %s1350_s15   ;;  %s1059_s14 = sphi %s1093_s14, %s1349_s14   ;;  %s1055_s13 = sphi %s1091_s13, %s1348_s13   ;;  %s1051_s12 = sphi %s1089_s12, %s1347_s12  }
   0x5   : > { %p39_p1 = scmp.eq.s32.totalorder %s1108_s16, 0  ;;  %p778_p2 = scmp.ge.s32.totalorder %s1063_s15, 1 }
   0x6   : > { %p122_p3 = scmp.lt.s32.totalorder %s1063_s15, 5  ;;  %s133_s20 = sshll.u32 %s1335_s1, 4  ;;  %s134_s20 = int_to_ptr.hbm [resolvable:$true] %s133_s20 }
   0x7   : > { %p1116_p4 = por %p39_p1, %p38_p0  ;;  %s1065_s22 = smov [#allocation4]  }
   0x8   : > { %p1123_p5 = pnand %p778_p2, %p122_p3  ;;  %s135_s23 = sshll.u32 %s1065_s22, 4  ;;  %s136_s23 = int_to_ptr.vmem [resolvable:$true] %s135_s23 }
   0x9   : > { %s1132_s24 = sadd.s32 1, %s1063_s15   ;;  %s1066_s25 = smov 128  }
   0xa   : > { %p900_p6 = pneg %p1123_p5  ;;  %s1067_s26 = smov 8  }
   0xb   : > { %s22_s27 = ssub.s32 %s1063_s15, %s1132_s24  ;;  %s25_s28 = sadd.s32 1, %s1059_s14 }
   0xc   : > { %p901_p7 = pnand %p900_p6, %p39_p1  ;;  %p23_p8 = scmp.eq.s32.totalorder %s22_s27, 0 }
   0xd   : > { %p32_p9 = scmp.ne.s32.totalorder %s1059_s14, %s1055_s13  ;;  %p33_p10 = scmp.eq.s32.totalorder %s1063_s15, 0 }
   0xe   : > { %903 = dma.hbm_to_vmem [thread:$0]  (!%p901_p7), %s134_s20, 2048, %s136_s23, [#allocation5], %s1066_s25, %s1066_s25, %s1067_s26  }
   0xf   : > { %p909_p11 = scmp.lt.s32.totalorder %s1063_s15, 4  ;;  %p34_p12 = por %p33_p10, %p32_p9 }
  0x10   : > { %s1145_s29 = scalar_select %p23_p8, %s1059_s14, %s25_s28  }
  0x11   : > { %s149_s30 = sand.u32 1, %s1059_s14   ;;  %s859_s5 = sshll.u32 %s1063_s15, 6 }
  0x12   : > { %s781_s4 = sshll.u32 %s149_s30, 6  ;;  %s158_s8 = scalar_lea.hbm %s1334_s0, %s859_s5 }
  0x13   : > { %s153_s9 = scalar_lea.vmem [#allocation2], %s781_s4  ;;  %s159_s11 = sshll.u32 %s158_s8, 4  ;;  %s160_s11 = int_to_ptr.hbm [resolvable:$true] %s159_s11 }
  0x14   : > { %s161_s10 = sshll.u32 %s153_s9, 4  ;;  %p1152_p13 = pnand %p909_p11, %p34_p12  ;;  %s162_s10 = int_to_ptr.vmem [resolvable:$true] %s161_s10 }
  0x15   : > { %s150_s18 = scalar_lea.sflag [#allocation3], %s149_s30  ;;  %s995_s19 = sshra.s32 %s160_s11, 4  ;;  %s996_s19 = int_to_ptr.hbm [resolvable:$true] %s995_s19 }
  0x16   : > { %s997_s20 = scalar_lea.hbm %s996_s19, 64  ;;  %p999_p2 = pneg %p1152_p13 }
  0x17   : > { %p998_p0 = scmp.ne.s32.totalorder %s996_s19, %s997_s20  ;;  %s1002_s23 = scalar_lea.hbm %s1334_s0, 256 }
  0x18   : > { %p1003_p7 = scmp.lt.s32.totalorder %s996_s19, %s1334_s0  ;;  %p1004_p8 = scmp.lt.s32.totalorder %s1002_s23, %s997_s20 }
  0x19   : > { %p1000_p3 = pnand %p999_p2, %p998_p0 }
  0x1a   : > { %p1005_p9 = por %p1004_p8, %p1003_p7 }
  0x1b   : > { %p1001_p6 = pneg %p1000_p3 }
  0x1d   : > { %p1006_p10 = pnand %p1005_p9, %p1001_p6 }
  0x1f   : > { %1009 = shalt.err (!%p1006_p10)
}
  0x20   : > { %907 = dma.hbm_to_vmem [thread:$0]  (!%p1152_p13), %s160_s11, 1024, %s162_s10, %s150_s18, %s1066_s25, %s1066_s25, %s1067_s26  }
  0x21   : > { %173 = sbr.rel (%p1123_p5) target bundleno = 495 (0x1ef), region = 28  ;;  %s175_s30 = sand.u32 (!%p1123_p5), 1, %s1055_s13  }
  0x22   : > { %s785_s4 = sshll.u32 (!%p1123_p5), %s175_s30, 6  ;;  %s176_s5 = scalar_lea.sflag (!%p1123_p5), [#allocation3], %s175_s30 }
  0x23   : > { %s179_s6 = scalar_lea.vmem (!%p1123_p5), [#allocation2], %s785_s4 }
  0x26   : > { %1042 = dma.done.wait (%p1116_p4), %s176_s5, 1024  }
  0x27   : > { %1044 = vsyncadd (%p1116_p4), %s176_s5, 4294966272 }
  0x28   : > { %1046 = dma.done.wait (%p39_p1), [#allocation5], 2048  }
  0x29   : > { %1048 = vsyncadd (%p39_p1), [#allocation5], 4294965248  ;;  %v231_v0 = vld [vmem:[%s179_s6 + $0x20] sm:$0xff]  ;;  %v229_v1 = vld [vmem:[%s179_s6 + $0x10] sm:$0xff]  ;;  %v1068_v8 = vmov 128.0   ;;  %s787_s17 = sshll.u32 %s1108_s16, 3 }
  0x2a   : > { %v227_v2 = vld [vmem:[%s179_s6] sm:$0xff]  ;;  %243 = vadd.xlane.f32.xlu1 %v231_v0  ;;  %239 = vadd.xlane.f32.xlu2 %v229_v1  ;;  %v232_v3 = vld [vmem:[%s179_s6 + $0x28] sm:$0xff]  ;;  %v230_v4 = vld [vmem:[%s179_s6 + $0x18] sm:$0xff]  ;;  %947 = vrcp.f32 %v1068_v8  ;;  %p216_p1 = scmp.lt.s32.totalorder %s787_s17, 31  ;;  %p222_p4 = scmp.lt.s32.totalorder %s1108_s16, 3 }
  0x2b   : > { %235 = vadd.xlane.f32.xlu0 %v227_v2  ;;  %v228_v5 = vld [vmem:[%s179_s6 + $0x8] sm:$0xff]  ;;  %v234_v6 = vld [vmem:[%s179_s6 + $0x38] sm:$0xff]  ;;  %v233_v7 = vld [vmem:[%s179_s6 + $0x30] sm:$0xff] }
  0x2c   : > { %v850_v47 = vld [vmem:[#allocation4 + $0x70] sm:$0xf]  ;;  %v877_v48 = vld [vmem:[#allocation4 + $0x74] sm:$0xf0]  ;;  %v876_v49 = vld [vmem:[#allocation4 + $0x74] sm:$0xf] }
  0x2d   : > { %v851_v50 = vor.u32 %v877_v48, %v850_v47  ;;  %v852_v51 = vld [vmem:[#allocation4 + $0x78] sm:$0xf0]  ;;  %v842_v53 = vld [vmem:[#allocation4 + $0x60] sm:$0xf]  ;;  %v875_v54 = vld [vmem:[#allocation4 + $0x64] sm:$0xf0] }
  0x2e   : > { %v855_v52 = vor.u32 %v876_v49, %v852_v51  ;;  %v874_v55 = vld [vmem:[#allocation4 + $0x64] sm:$0xf]  ;;  %v843_v56 = vor.u32 %v875_v54, %v842_v53  ;;  %v844_v57 = vld [vmem:[#allocation4 + $0x68] sm:$0xf0]  ;;  %v834_v59 = vld [vmem:[#allocation4 + $0x50] sm:$0xf] }
  0x2f   : > { %502 = vmatpush.bf16.msra.mxu0 %v851_v50  ;;  %878 = vmatpush.bf16.msra.mxu2 %v851_v50  ;;  %v847_v58 = vor.u32 %v874_v55, %v844_v57  ;;  %v873_v60 = vld [vmem:[#allocation4 + $0x54] sm:$0xf0]  ;;  %v872_v61 = vld [vmem:[#allocation4 + $0x54] sm:$0xf]  ;;  %v836_v63 = vld [vmem:[#allocation4 + $0x58] sm:$0xf0] }
  0x30   : > { %v948_v9 = vpop.eup %947  ;;  %531 = vmatpush.bf16.msra.mxu1 %v855_v52  ;;  %886 = vmatpush.bf16.msra.mxu3 %v855_v52  ;;  %v835_v62 = vor.u32 %v873_v60, %v834_v59  ;;  %v869_v8 = vld [vmem:[#allocation4 + $0x34] sm:$0xf0]  ;;  %s1352_s17 = smov (!%p216_p1, %s787_s17), 31  ;;  %s1354_s16 = smov (!%p222_p4, %s1108_s16), 3 }
  0x31   : > { %v252_v10 = vmul.f32 128.0, %v948_v9  ;;  %vm256_vm0 = vweird.f32 %v948_v9  ;;  %s860_s21 = sshll.u32 %s1352_s17, 3  ;;  %s861_s8 = sshll.u32 %s1354_s16, 4 }
  0x32   : > { %245 = vadd.xlane.f32.xlu1 %v232_v3  ;;  %241 = vadd.xlane.f32.xlu2 %v230_v4  ;;  %s1306_s7 = scalar_lea.vmem %s1336_s2, %s860_s21  ;;  %s226_s11 = scalar_lea.vmem %s1337_s3, %s861_s8 }
  0x33   : > { %237 = vadd.xlane.f32.xlu0 %v228_v5  ;;  %v253_v11 = vsub.f32 1.0, %v252_v10  ;;  %503 = vmatpush.bf16.msra.mxu0 %v843_v56 }
  0x34   : > { %879 = vmatpush.bf16.msra.mxu2 %v843_v56  ;;  %532 = vmatpush.bf16.msra.mxu1 %v847_v58 }
  0x35   : > { %v254_v12 = vmul.f32 %v948_v9, %v253_v11  ;;  %887 = vmatpush.bf16.msra.mxu3 %v847_v58  ;;  %v820_v11 = vld [vmem:[#allocation4 + $0x38] sm:$0xf0] }
  0x37   : > { %v255_v13 = vadd.f32 %v948_v9, %v254_v12  ;;  %504 = vmatpush.bf16.msra.mxu0 %v835_v62 }
  0x38   : > { %880 = vmatpush.bf16.msra.mxu2 %v835_v62 }
  0x39   : > { %v1180_v14 = vsel %vm256_vm0, %v948_v9, %v255_v13  ;;  %v868_v9 = vld [vmem:[#allocation4 + $0x34] sm:$0xf]  ;;  %v810_v13 = vld [vmem:[#allocation4 + $0x20] sm:$0xf] }
  0x3a   : > { %249 = vadd.xlane.f32.xlu1 %v234_v6  ;;  %v823_v12 = vor.u32 %v868_v9, %v820_v11 }
  0x3b   : > { %247 = vadd.xlane.f32.xlu0 %v233_v7 }
  0x9d   : > { %v244_v15 = vpop.xlane.xlu1 %243  ;;  %v240_v16 = vpop.xlane.xlu2 %239 }
  0x9e   : > { %v262_v17 = vmul.f32 %v1180_v14, %v244_v15  ;;  %v236_v18 = vpop.xlane.xlu0 %235  ;;  %v260_v32 = vmul.f32 %v1180_v14, %v240_v16  ;;  %v867_v15 = vld [vmem:[#allocation4 + $0x24] sm:$0xf0]  ;;  %v866_v16 = vld [vmem:[#allocation4 + $0x24] sm:$0xf] }
  0x9f   : > { %v258_v19 = vmul.f32 %v1180_v14, %v236_v18  ;;  %v812_v18 = vld [vmem:[#allocation4 + $0x28] sm:$0xf0] }
  0xa0   : > { %v1184_v20 = vsub.f32 %v231_v0, %v262_v17  ;;  %v1208_v37 = vsub.f32 %v229_v1, %v260_v32  ;;  %v839_v0 = vor.u32 %v872_v61, %v836_v63  ;;  %v826_v1 = vld [vmem:[#allocation4 + $0x40] sm:$0xf]  ;;  %v811_v17 = vor.u32 %v867_v15, %v810_v13  ;;  %v862_v32 = vld [vmem:[#allocation4 + $0x4] sm:$0xf] }
  0xa1   : > { %v1186_v21 = vsub.f32 %v227_v2, %v258_v19  ;;  %v871_v2 = vld [vmem:[#allocation4 + $0x44] sm:$0xf0]  ;;  %v815_v19 = vor.u32 %v866_v16, %v812_v18 }
  0xa2   : > { %v278_v22 = vmul.f32 %v1184_v20, %v1184_v20  ;;  %v276_v42 = vmul.f32 %v1208_v37, %v1208_v37  ;;  %533 = vmatpush.bf16.msra.mxu1 %v839_v0  ;;  %888 = vmatpush.bf16.msra.mxu3 %v839_v0 }
  0xa3   : > { %v274_v23 = vmul.f32 %v1186_v21, %v1186_v21 }
  0xa4   : > { %290 = vadd.xlane.f32.xlu1 %v278_v22  ;;  %v802_v22 = vld [vmem:[#allocation4 + $0x10] sm:$0xf] }
  0xa5   : > { %282 = vadd.xlane.f32.xlu2 %v274_v23  ;;  %v246_v24 = vpop.xlane.xlu1 %245  ;;  %v242_v25 = vpop.xlane.xlu2 %241  ;;  %v865_v23 = vld [vmem:[#allocation4 + $0x14] sm:$0xf0] }
  0xa6   : > { %v263_v26 = vmul.f32 %v1180_v14, %v246_v24  ;;  %v261_v27 = vmul.f32 %v1180_v14, %v242_v25  ;;  %v238_v28 = vpop.xlane.xlu0 %237  ;;  %v864_v24 = vld [vmem:[#allocation4 + $0x14] sm:$0xf]  ;;  %v803_v25 = vor.u32 %v865_v23, %v802_v22 }
  0xa7   : > { %v259_v29 = vmul.f32 %v1180_v14, %v238_v28  ;;  %v794_v28 = vld [vmem:[#allocation4] sm:$0xf] }
  0xa8   : > { %v1195_v30 = vsub.f32 %v232_v3, %v263_v26  ;;  %v1197_v31 = vsub.f32 %v230_v4, %v261_v27  ;;  %v870_v3 = vld [vmem:[#allocation4 + $0x44] sm:$0xf]  ;;  %v827_v4 = vor.u32 %v871_v2, %v826_v1  ;;  %v804_v26 = vld [vmem:[#allocation4 + $0x18] sm:$0xf0] }
  0xa9   : > { %v1200_v33 = vsub.f32 %v228_v5, %v259_v29  ;;  %v828_v5 = vld [vmem:[#allocation4 + $0x48] sm:$0xf0]  ;;  %v807_v27 = vor.u32 %v864_v24, %v804_v26  ;;  %v863_v29 = vld [vmem:[#allocation4 + $0x4] sm:$0xf0] }
  0xaa   : > { %v277_v34 = vmul.f32 %v1197_v31, %v1197_v31  ;;  %v279_v35 = vmul.f32 %v1195_v30, %v1195_v30  ;;  %505 = vmatpush.bf16.msra.mxu0 %v827_v4  ;;  %881 = vmatpush.bf16.msra.mxu2 %v827_v4 }
  0xab   : > { %v275_v36 = vmul.f32 %v1200_v33, %v1200_v33 }
  0xac   : > { %288 = vadd.xlane.f32.xlu1 %v277_v34 }
  0xad   : > { %292 = vadd.xlane.f32.xlu2 %v279_v35  ;;  %284 = vadd.xlane.f32.xlu0 %v275_v36  ;;  %v250_v39 = vpop.xlane.xlu1 %249  ;;  %v795_v35 = vor.u32 %v863_v29, %v794_v28  ;;  %v796_v36 = vld [vmem:[#allocation4 + $0x8] sm:$0xf0] }
  0xae   : > { %v248_v38 = vpop.xlane.xlu0 %247  ;;  %v265_v43 = vmul.f32 %v1180_v14, %v250_v39 }
  0xaf   : > { %v264_v40 = vmul.f32 %v1180_v14, %v248_v38 }
  0xb0   : > { %v1218_v45 = vsub.f32 %v234_v6, %v265_v43  ;;  %v831_v6 = vor.u32 %v870_v3, %v828_v5 }
  0xb1   : > { %v1211_v41 = vsub.f32 %v233_v7, %v264_v40  ;;  %v818_v7 = vld [vmem:[#allocation4 + $0x30] sm:$0xf]  ;;  %v799_v40 = vor.u32 %v862_v32, %v796_v36 }
  0xb2   : > { %v281_v46 = vmul.f32 %v1218_v45, %v1218_v45  ;;  %534 = vmatpush.bf16.msra.mxu1 %v831_v6  ;;  %889 = vmatpush.bf16.msra.mxu3 %v831_v6  ;;  %v819_v10 = vor.u32 %v869_v8, %v818_v7 }
  0xb3   : > { %v280_v44 = vmul.f32 %v1211_v41, %v1211_v41 }
  0xb4   : > { %506 = vmatpush.bf16.msra.mxu0 %v819_v10  ;;  %882 = vmatpush.bf16.msra.mxu2 %v819_v10 }
  0xb5   : > { %286 = vadd.xlane.f32.xlu0 %v276_v42  ;;  %294 = vadd.xlane.f32.xlu2 %v280_v44 }
  0xb6   : > { %535 = vmatpush.bf16.msra.mxu1 %v823_v12  ;;  %890 = vmatpush.bf16.msra.mxu3 %v823_v12 }
  0xb8   : > { %507 = vmatpush.bf16.msra.mxu0 %v811_v17  ;;  %883 = vmatpush.bf16.msra.mxu2 %v811_v17 }
  0xba   : > { %536 = vmatpush.bf16.msra.mxu1 %v815_v19  ;;  %891 = vmatpush.bf16.msra.mxu3 %v815_v19 }
  0xbc   : > { %508 = vmatpush.bf16.msra.mxu0 %v803_v25  ;;  %884 = vmatpush.bf16.msra.mxu2 %v803_v25 }
  0xbd   : > { %296 = vadd.xlane.f32.xlu0 %v281_v46 }
  0xbe   : > { %537 = vmatpush.bf16.msra.mxu1 %v807_v27  ;;  %892 = vmatpush.bf16.msra.mxu3 %v807_v27 }
  0xc0   : > { %509 = vmatpush.bf16.msra.mxu0 %v795_v35  ;;  %885 = vmatpush.bf16.msra.mxu2 %v795_v35 }
  0xc2   : > { %538 = vmatpush.bf16.msra.mxu1 %v799_v40  ;;  %893 = vmatpush.bf16.msra.mxu3 %v799_v40 }
 0x117   : > { %v291_v34 = vpop.xlane.xlu1 %290 }
 0x118   : > { %v302_v38 = vmul.f32 %v291_v34, %v1180_v14  ;;  %v283_v39 = vpop.xlane.xlu2 %282 }
 0x119   : > { %v298_v42 = vmul.f32 %v283_v39, %v1180_v14 }
 0x11a   : > { %v310_v43 = vadd.f32 1e-05, %v302_v38 }
 0x11b   : > { %v306_v44 = vadd.f32 1e-05, %v298_v42 }
 0x11c   : > { %949 = vrsqrt.f32 %v310_v43  ;;  %vm360_vm3 = vweird.f32 %v310_v43 }
 0x11d   : > { %951 = vrsqrt.f32 %v306_v44  ;;  %vm320_vm6 = vweird.f32 %v306_v44 }
 0x11f   : > { %v289_v46 = vpop.xlane.xlu1 %288 }
 0x120   : > { %v301_v47 = vmul.f32 %v289_v46, %v1180_v14  ;;  %v293_v48 = vpop.xlane.xlu2 %292  ;;  %v285_v49 = vpop.xlane.xlu0 %284 }
 0x121   : > { %v303_v50 = vmul.f32 %v293_v48, %v1180_v14  ;;  %v299_v51 = vmul.f32 %v285_v49, %v1180_v14 }
 0x122   : > { %v1227_v52 = vpop.eup %949  ;;  %v1233_v58 = vadd.f32 1e-05, %v301_v47 }
 0x123   : > { %v1229_v53 = vpop.eup %951  ;;  %v355_v54 = vmul.f32 %v1227_v52, %v310_v43  ;;  %v311_v55 = vadd.f32 1e-05, %v303_v50  ;;  %v307_v56 = vadd.f32 1e-05, %v299_v51  ;;  %vm361_vm1 = vweird.f32 %v1227_v52 }
 0x124   : > { %v315_v57 = vmul.f32 %v1229_v53, %v306_v44  ;;  %vm321_vm2 = vweird.f32 %v1229_v53  ;;  %vm1257_vm5 = vmor %vm360_vm3, %vm361_vm1  ;;  %vm350_vm13 = vweird.f32 %v1233_v58 }
 0x125   : > { %v356_v59 = vmul.f32 %v1227_v52, %v355_v54  ;;  %953 = vrsqrt.f32 %v311_v55  ;;  %vm370_vm7 = vweird.f32 %v311_v55  ;;  %vm1263_vm8 = vmor %vm320_vm6, %vm321_vm2  ;;  %vm330_vm11 = vweird.f32 %v307_v56 }
 0x126   : > { %v316_v60 = vmul.f32 %v1229_v53, %v315_v57  ;;  %955 = vrsqrt.f32 %v307_v56 }
 0x127   : > { %v357_v61 = vmul.f32 0.5, %v356_v59  ;;  %957 = vrsqrt.f32 %v1233_v58 }
 0x128   : > { %v295_v62 = vpop.xlane.xlu2 %294  ;;  %v287_v63 = vpop.xlane.xlu0 %286  ;;  %v317_v2 = vmul.f32 0.5, %v316_v60 }
 0x129   : > { %v304_v0 = vmul.f32 %v295_v62, %v1180_v14  ;;  %v300_v1 = vmul.f32 %v287_v63, %v1180_v14  ;;  %v358_v7 = vsub.f32 1.5, %v357_v61 }
 0x12a   : > { %v318_v11 = vsub.f32 1.5, %v317_v2 }
 0x12b   : > { %v954_v3 = vpop.eup %953  ;;  %v1240_v4 = vadd.f32 1e-05, %v304_v0  ;;  %v1242_v5 = vadd.f32 1e-05, %v300_v1  ;;  %v359_v17 = vmul.f32 %v1227_v52, %v358_v7 }
 0x12c   : > { %v956_v6 = vpop.eup %955  ;;  %v365_v8 = vmul.f32 %v954_v3, %v311_v55  ;;  %vm371_vm4 = vweird.f32 %v954_v3  ;;  %v319_v24 = vmul.f32 %v1229_v53, %v318_v11 }
 0x12d   : > { %v325_v9 = vmul.f32 %v956_v6, %v307_v56  ;;  %959 = vrsqrt.f32 %v1240_v4  ;;  %v1245_v10 = vpop.eup %957  ;;  %vm331_vm9 = vweird.f32 %v956_v6  ;;  %v363_v34 = vsel %vm1257_vm5, %v1227_v52, %v359_v17  ;;  %vm372_vm10 = vmor %vm370_vm7, %vm371_vm4 }
 0x12e   : > { %v366_v12 = vmul.f32 %v954_v3, %v365_v8  ;;  %961 = vrsqrt.f32 %v1242_v5  ;;  %v345_v18 = vmul.f32 %v1245_v10, %v1233_v58  ;;  %v323_v40 = vsel %vm1263_vm8, %v1229_v53, %v319_v24  ;;  %vm332_vm12 = vmor %vm330_vm11, %vm331_vm9 }
 0x12f   : > { %v326_v13 = vmul.f32 %v956_v6, %v325_v9  ;;  %v398_v46 = vmul.f32 %v363_v34, %v1184_v20  ;;  %v394_v51 = vmul.f32 %v323_v40, %v1186_v21  ;;  %vm351_vm14 = vweird.f32 %v1245_v10 }
 0x130   : > { %v367_v15 = vmul.f32 0.5, %v366_v12  ;;  %v297_v16 = vpop.xlane.xlu0 %296  ;;  %v346_v36 = vmul.f32 %v1245_v10, %v345_v18  ;;  %vm380_vm15 = vweird.f32 %v1240_v4  ;;  %vm1288_vm2 = vmor %vm350_vm13, %vm351_vm14  ;;  %vm340_vm4 = vweird.f32 %v1242_v5 }
 0x131   : > { %v327_v19 = vmul.f32 0.5, %v326_v13  ;;  %v305_v22 = vmul.f32 %v297_v16, %v1180_v14  ;;  %vm605_vm9 = vcmask 1040384  }
 0x132   : > { %v368_v23 = vsub.f32 1.5, %v367_v15  ;;  %v347_v55 = vmul.f32 0.5, %v346_v36 }
 0x133   : > { %v1255_v25 = vpop.eup %959  ;;  %v328_v27 = vsub.f32 1.5, %v327_v19  ;;  %v313_v28 = vadd.f32 1e-05, %v305_v22 }
 0x134   : > { %v962_v29 = vpop.eup %961  ;;  %v375_v32 = vmul.f32 %v1255_v25, %v1240_v4  ;;  %v369_v35 = vmul.f32 %v954_v3, %v368_v23  ;;  %v348_v20 = vsub.f32 1.5, %v347_v55  ;;  %vm381_vm0 = vweird.f32 %v1255_v25 }
 0x135   : > { %v335_v38 = vmul.f32 %v962_v29, %v1242_v5  ;;  %963 = vrsqrt.f32 %v313_v28  ;;  %v329_v42 = vmul.f32 %v956_v6, %v328_v27  ;;  %vm341_vm1 = vweird.f32 %v962_v29  ;;  %vm382_vm3 = vmor %vm380_vm15, %vm381_vm0 }
 0x136   : > { %v376_v39 = vmul.f32 %v1255_v25, %v375_v32  ;;  %v373_v43 = vsel %vm372_vm10, %v954_v3, %v369_v35  ;;  %v349_v63 = vmul.f32 %v1245_v10, %v348_v20  ;;  %vm342_vm6 = vmor %vm340_vm4, %vm341_vm1  ;;  %vm390_vm7 = vweird.f32 %v313_v28 }
 0x137   : > { %v336_v44 = vmul.f32 %v962_v29, %v335_v38  ;;  %v399_v47 = vmul.f32 %v373_v43, %v1195_v30  ;;  %v333_v49 = vsel %vm332_vm12, %v956_v6, %v329_v42 }
 0x138   : > { %v377_v48 = vmul.f32 0.5, %v376_v39  ;;  %v395_v52 = vmul.f32 %v333_v49, %v1200_v33  ;;  %v353_v3 = vsel %vm1288_vm2, %v1245_v10, %v349_v63 }
 0x139   : > { %v337_v50 = vmul.f32 0.5, %v336_v44  ;;  %v404_v54 = vpack.c.bf16 %v399_v47, %v398_v46  ;;  %v397_v8 = vmul.f32 %v353_v3, %v1197_v31 }
 0x13a   : > { %v402_v57 = vpack.c.bf16 %v395_v52, %v394_v51  ;;  %v378_v53 = vsub.f32 1.5, %v377_v48 }
 0x13b   : > { %v964_v56 = vpop.eup %963  ;;  %520 = vmatmul.bf16.vlgmr.msra.gmra.mxu2 %v404_v54  ;;  %549 = vmatmul.bf16.vlgmr.msra.gmra.mxu3 %v404_v54  ;;  %v338_v59 = vsub.f32 1.5, %v337_v50 }
 0x13c   : > { %v385_v60 = vmul.f32 %v964_v56, %v313_v28  ;;  %510 = vmatmul.bf16.vlgmr.msra.gmra.mxu0 %v402_v57  ;;  %539 = vmatmul.bf16.vlgmr.msra.gmra.mxu1 %v402_v57  ;;  %v379_v61 = vmul.f32 %v1255_v25, %v378_v53  ;;  %vm391_vm5 = vweird.f32 %v964_v56 }
 0x13d   : > { %v339_v33 = vmul.f32 %v962_v29, %v338_v59  ;;  %vm392_vm8 = vmor %vm390_vm7, %vm391_vm5 }
 0x13e   : > { %v386_v30 = vmul.f32 %v964_v56, %v385_v60  ;;  %v383_v1 = vsel %vm382_vm3, %v1255_v25, %v379_v61 }
 0x13f   : > { %v343_v0 = vsel %vm342_vm6, %v962_v29, %v339_v33  ;;  %v400_v5 = vmul.f32 %v383_v1, %v1211_v41 }
 0x140   : > { %v387_v21 = vmul.f32 0.5, %v386_v30  ;;  %v396_v6 = vmul.f32 %v343_v0, %v1208_v37 }
 0x142   : > { %v388_v58 = vsub.f32 1.5, %v387_v21  ;;  %v403_v11 = vpack.c.bf16 %v397_v8, %v396_v6 }
 0x144   : > { %v389_v2 = vmul.f32 %v964_v56, %v388_v58 }
 0x146   : > { %v393_v4 = vsel %vm392_vm8, %v964_v56, %v389_v2 }
 0x147   : > { %v401_v7 = vmul.f32 %v393_v4, %v1218_v45 }
 0x149   : > { %v405_v9 = vpack.c.bf16 %v401_v7, %v400_v5 }
 0x14b   : > { %525 = vmatmul.bf16.gmra.mxu2 %v405_v9  ;;  %554 = vmatmul.bf16.gmra.mxu3 %v405_v9 }
 0x14c   : > { %515 = vmatmul.bf16.gmra.mxu0 %v403_v11  ;;  %544 = vmatmul.bf16.gmra.mxu1 %v403_v11 }
 0x1b9   : > { %v511_v10 = vpop.f32.mrf.mxu0  ;;  %v540_v31 = vpop.f32.mrf.mxu1 }
 0x1ba   : > { %v560_v37 = vpack.c.bf16 %v540_v31, %v511_v10  ;;  %v614_v26 = vmul.f32 %v511_v10, %v511_v10  ;;  %v615_v36 = vmul.f32 %v540_v31, %v540_v31 }
 0x1bc   : > { %568 = vst [vmem:[%s1306_s7] sm:$0xff] %v560_v37 }
 0x1be   : > { %v521_v41 = vpop.f32.mrf.mxu2  ;;  %v550_v45 = vpop.f32.mrf.mxu3 }
 0x1bf   : > { %v564_v12 = vpack.c.bf16 %v550_v45, %v521_v41  ;;  %v622_v55 = vmul.f32 %v521_v41, %v521_v41  ;;  %v623_v59 = vmul.f32 %v550_v45, %v550_v45 }
 0x1c1   : > { %572 = vst [vmem:[%s1306_s7 + $0x20] sm:$0xff] %v564_v12  ;;  %v513_v13 = vpop.f32.mrf.mxu0  ;;  %v542_v15 = vpop.f32.mrf.mxu1 }
 0x1c2   : > { %v561_v16 = vpack.c.bf16 %v542_v15, %v513_v13  ;;  %v616_v25 = vmul.f32 %v513_v13, %v513_v13  ;;  %v617_v27 = vmul.f32 %v542_v15, %v542_v15  ;;  %v576_v32 = vadd.f32 %v513_v13, %v511_v10 }
 0x1c3   : > { %v589_v34 = vadd.f32 %v542_v15, %v540_v31 }
 0x1c4   : > { %569 = vst [vmem:[%s1306_s7 + $0x8] sm:$0xff] %v561_v16  ;;  %v630_v38 = vadd.f32 %v616_v25, %v614_v26  ;;  %v643_v43 = vadd.f32 %v617_v27, %v615_v36 }
 0x1c6   : > { %v523_v17 = vpop.f32.mrf.mxu2  ;;  %v552_v18 = vpop.f32.mrf.mxu3 }
 0x1c7   : > { %v565_v19 = vpack.c.bf16 %v552_v18, %v523_v17  ;;  %v624_v21 = vmul.f32 %v523_v17, %v523_v17  ;;  %v625_v58 = vmul.f32 %v552_v18, %v552_v18 }
 0x1c9   : > { %573 = vst [vmem:[%s1306_s7 + $0x28] sm:$0xff] %v565_v19  ;;  %v516_v22 = vpop.f32.mrf.mxu0  ;;  %v545_v23 = vpop.f32.mrf.mxu1 }
 0x1ca   : > { %v562_v24 = vpack.c.bf16 %v545_v23, %v516_v22  ;;  %v618_v28 = vmul.f32 %v516_v22, %v516_v22  ;;  %v619_v39 = vmul.f32 %v545_v23, %v545_v23  ;;  %v577_v40 = vadd.f32 %v576_v32, %v516_v22 }
 0x1cb   : > { %v590_v42 = vadd.f32 %v589_v34, %v545_v23  ;;  %v608_v32 = vlaneseq }
 0x1cc   : > { %570 = vst [vmem:[%s1306_s7 + $0x10] sm:$0xff] %v562_v24  ;;  %v631_v44 = vadd.f32 %v630_v38, %v618_v28  ;;  %v644_v52 = vadd.f32 %v643_v43, %v619_v39 }
 0x1cd   : > { %vm610_vm10 = vcmp.lt.s32.totalorder %v608_v32, 256 }
 0x1ce   : > { %v526_v29 = vpop.f32.mrf.mxu2  ;;  %v555_v14 = vpop.f32.mrf.mxu3 }
 0x1cf   : > { %v566_v35 = vpack.c.bf16 %v555_v14, %v526_v29  ;;  %v626_v1 = vmul.f32 %v526_v29, %v526_v29  ;;  %v627_v4 = vmul.f32 %v555_v14, %v555_v14 }
 0x1d1   : > { %574 = vst [vmem:[%s1306_s7 + $0x30] sm:$0xff] %v566_v35  ;;  %v518_v46 = vpop.f32.mrf.mxu0  ;;  %v547_v47 = vpop.f32.mrf.mxu1 }
 0x1d2   : > { %v578_v48 = vadd.f32 %v577_v40, %v518_v46  ;;  %v620_v49 = vmul.f32 %v518_v46, %v518_v46  ;;  %v563_v50 = vpack.c.bf16 %v547_v47, %v518_v46  ;;  %v591_v51 = vadd.f32 %v590_v42, %v547_v47 }
 0x1d3   : > { %v621_v54 = vmul.f32 %v547_v47, %v547_v47 }
 0x1d4   : > { %v579_v56 = vadd.f32 %v578_v48, %v521_v41  ;;  %v632_v57 = vadd.f32 %v631_v44, %v620_v49  ;;  %571 = vst [vmem:[%s1306_s7 + $0x18] sm:$0xff] %v563_v50  ;;  %v592_v53 = vadd.f32 %v591_v51, %v550_v45 }
 0x1d5   : > { %v645_v60 = vadd.f32 %v644_v52, %v621_v54 }
 0x1d6   : > { %v528_v20 = vpop.f32.mrf.mxu2  ;;  %v557_v30 = vpop.f32.mrf.mxu3  ;;  %v633_v33 = vadd.f32 %v632_v57, %v622_v55  ;;  %v580_v61 = vadd.f32 %v579_v56, %v523_v17  ;;  %v593_v0 = vadd.f32 %v592_v53, %v552_v18 }
 0x1d7   : > { %v567_v62 = vpack.c.bf16 %v557_v30, %v528_v20  ;;  %v646_v63 = vadd.f32 %v645_v60, %v623_v59  ;;  %v628_v8 = vmul.f32 %v528_v20, %v528_v20  ;;  %v629_v10 = vmul.f32 %v557_v30, %v557_v30 }
 0x1d8   : > { %v581_v2 = vadd.f32 %v580_v61, %v526_v29  ;;  %v634_v3 = vadd.f32 %v633_v33, %v624_v21  ;;  %v594_v6 = vadd.f32 %v593_v0, %v555_v14 }
 0x1d9   : > { %575 = vst [vmem:[%s1306_s7 + $0x38] sm:$0xff] %v567_v62  ;;  %v647_v5 = vadd.f32 %v646_v63, %v625_v58 }
 0x1da   : > { %v582_v7 = vadd.f32 %v581_v2, %v528_v20  ;;  %v635_v9 = vadd.f32 %v634_v3, %v626_v1  ;;  %v595_v11 = vadd.f32 %v594_v6, %v557_v30 }
 0x1db   : > { %v648_v31 = vadd.f32 %v647_v5, %v627_v4 }
 0x1dc   : > { %v583_v37 = vrot.slane %v582_v7, 4  ;;  %v636_v41 = vadd.f32 %v635_v9, %v628_v8  ;;  %v596_v45 = vrot.slane %v595_v11, 4 }
 0x1dd   : > { %v649_v12 = vadd.f32 %v648_v31, %v629_v10 }
 0x1de   : > { %v584_v13 = vadd.f32 %v583_v37, %v582_v7  ;;  %v637_v15 = vrot.slane %v636_v41, 4  ;;  %v597_v16 = vadd.f32 %v596_v45, %v595_v11 }
 0x1df   : > { %v650_v17 = vrot.slane %v649_v12, 4 }
 0x1e0   : > { %v585_v18 = vrot.slane %v584_v13, 2  ;;  %v638_v19 = vadd.f32 %v637_v15, %v636_v41  ;;  %v598_v22 = vrot.slane %v597_v16, 2 }
 0x1e1   : > { %v651_v23 = vadd.f32 %v650_v17, %v649_v12 }
 0x1e2   : > { %v586_v24 = vadd.f32 %v585_v18, %v584_v13  ;;  %v639_v25 = vrot.slane %v638_v19, 2  ;;  %v599_v26 = vadd.f32 %v598_v22, %v597_v16 }
 0x1e3   : > { %v652_v27 = vrot.slane %v651_v23, 2 }
 0x1e4   : > { %v640_v28 = vadd.f32 %v639_v25, %v638_v19  ;;  %v587_v29 = vrot.slane %v586_v24, 1  ;;  %v600_v14 = vrot.slane %v599_v26, 1 }
 0x1e5   : > { %v653_v34 = vadd.f32 %v652_v27, %v651_v23 }
 0x1e6   : > { %v641_v35 = vrot.slane %v640_v28, 1  ;;  %v601_v36 = vadd.f32 %v600_v14, %v599_v26  ;;  %v588_v39 = vadd.f32 %v587_v29, %v586_v24 }
 0x1e7   : > { %v654_v38 = vrot.slane %v653_v34, 1 }
 0x1e8   : > { %v604_v40 = vrot.slane %v601_v36, 7  ;;  %v642_v43 = vadd.f32 %v641_v35, %v640_v28 }
 0x1e9   : > { %v655_v42 = vadd.f32 %v654_v38, %v653_v34 }
 0x1ea   : > { %v606_v44 = vsel %vm605_vm9, %v588_v39, %v604_v40 }
 0x1eb   : > { %v658_v46 = vrot.slane %v655_v42, 7  ;;  %612 = vst.msk [vmem:[%s226_s11] ss:$8 sm:$0x3] %vm610_vm10, %v606_v44 }
 0x1ed   : > { %v659_v47 = vsel %vm605_vm9, %v642_v43, %v658_v46 }
 0x1ee   : > { %856 = vst.msk [vmem:[%s226_s11 + $0x1] ss:$8 sm:$0x3] %vm610_vm10, %v659_v47 }
 0x1ef PF: > { %p15_p5 = scmp.ge.s32.totalorder %s1132_s24, 6   ;;  %s1347_s12 = smov %s1055_s13 }
 0x1f0   : > { %s1348_s13 = smov %s1059_s14  ;;  %s1349_s14 = smov %s1145_s29 }
 0x1f1   : > { %s1350_s15 = smov %s1132_s24  ;;  %17 = sbr.rel (!%p15_p5) target bundleno = 4 (0x4), region = 85 }
 0x1f6   :  { %704 = vsyncpa [#allocation3], 1 }
 0x1f7   :  { %706 = vsyncpa [#allocation3 + $0x1], 1 }
 0x1f8   :  { %707 = vsyncpa [#allocation5], 1 }

// kernel: projection_head.3
= control target key start
LH: loop header
LB: loop body
LE: loop exit
PB: predicated region body
PF: predicated region fallthrough
CT: control target
= control target key end

     0   :  { %10 = vsyncpa [#allocation3], 0  ;;  %s1228_s0 = inlined_call_operand.vmem [shape: bf16[256,256], index: 0, kind: input, shape index: {}]   ;;  %s1229_s1 = inlined_call_operand.vmem [shape: f32[1,256], index: 1, kind: input, shape index: {}]   ;;  %s1230_s2 = inlined_call_operand.vmem [shape: f32[1,256], index: 2, kind: input, shape index: {}]   ;;  %s1231_s3 = inlined_call_operand.vmem [shape: bf16[256,128], index: 3, kind: input, shape index: {}]   ;;  %s1232_s4 = inlined_call_operand.vmem [shape: f32[1,128], index: 4, kind: input, shape index: {}]   ;;  %s1233_s5 = inlined_call_operand.hbm [shape: f32[256,128], index: 5, kind: output, shape index: {}]  }
   0x1   :  { %12 = vsyncpa [#allocation3 + $0x1], 0  ;;  %s982_s18 = smov 0   ;;  %s984_s19 = smov 0  }
   0x2   :  { %s986_s20 = smov 0   ;;  %s988_s21 = smov 0  }
   0x3 LB: > { %s1003_s22 = sadd.s32 4294967295, %s948_s21   ;;  %s717_s23 = sadd.s32 4294967294, %s948_s21   ;;  %s948_s21 = sphi %s988_s21, %s1239_s21   ;;  %s944_s20 = sphi %s986_s20, %s1238_s20   ;;  %s940_s19 = sphi %s984_s19, %s1237_s19   ;;  %s936_s18 = sphi %s982_s18, %s1236_s18  }
   0x4   : > { %s1007_s24 = sadd.s32 1, %s948_s21   ;;  %s135_s25 = sadd.s32 1, %s944_s20 }
   0x5   : > { %s132_s26 = ssub.s32 %s948_s21, %s1007_s24  ;;  %p145_p0 = scmp.ne.s32.totalorder %s944_s20, %s940_s19 }
   0x6   : > { %p133_p1 = scmp.eq.s32.totalorder %s132_s26, 0  ;;  %p146_p2 = scmp.eq.s32.totalorder %s1003_s22, 3 }
   0x7   : > { %p151_p3 = scmp.ne.s32.totalorder %s940_s19, %s936_s18  ;;  %p152_p4 = scmp.eq.s32.totalorder %s717_s23, 3 }
   0x8   : > { %s1018_s27 = scalar_select %p133_p1, %s944_s20, %s135_s25  }
   0x9   : > { %p1020_p5 = por %p146_p2, %p145_p0  ;;  %p1024_p6 = por %p152_p4, %p151_p3 }
   0xa   : > { %p720_p7 = scmp.ge.s32.totalorder %s948_s21, 1  ;;  %p192_p8 = scmp.lt.s32.totalorder %s948_s21, 5 }
   0xc   : > { %p193_p9 = pnand %p720_p7, %p192_p8 }
   0xd   : > { %s722_s9 = sshll.u32 (!%p193_p9), %s1003_s22, 3  ;;  %s218_s16 = sand.u32 (!%p193_p9), 1, %s940_s19  }
   0xe   : > { %196 = sbr.rel (%p193_p9) target bundleno = 357 (0x165), region = 40  ;;  %p222_p10 = scmp.lt.s32.totalorder (!%p193_p9), %s722_s9, 31 }
   0xf   : > { %s721_s17 = sshll.u32 (!%p193_p9), %s218_s16, 6  ;;  %s811_s26 = sshll.u32 (!%p193_p9), %s1003_s22, 6 }
  0x10   : > { %s1177_s23 = scalar_lea.vmem (!%p193_p9), [#allocation2], %s721_s17  ;;  %s651_s7 = scalar_lea.hbm (!%p193_p9), %s1233_s5, %s811_s26 }
  0x11   : > { %s652_s8 = sshll.u32 (!%p193_p9), %s1177_s23, 4  ;;  %s640_s22 = scalar_lea.sflag (!%p193_p9), [#allocation3], %s218_s16  ;;  %s653_s8 = int_to_ptr.vmem [resolvable:$true] %s652_s8 }
  0x13   : > { %v802_v0 = vld [vmem:[%s1231_s3 + $0x38] sm:$0xff]  ;;  %v801_v2 = vld [vmem:[%s1231_s3 + $0x30] sm:$0xff]  ;;  %s1241_s9 = smov (!%p222_p10, %s722_s9), 31  ;;  %v800_v4 = vld [vmem:[%s1231_s3 + $0x28] sm:$0xff] }
  0x14   : > { %v810_v1 = vld [vmem:[%s1231_s3 + $0x78] sm:$0xff]  ;;  %453 = vmatpush.bf16.msra.mxu0 %v802_v0  ;;  %812 = vmatpush.bf16.msra.mxu2 %v802_v0  ;;  %v809_v3 = vld [vmem:[%s1231_s3 + $0x70] sm:$0xff]  ;;  %s794_s14 = sshll.u32 %s1241_s9, 3  ;;  %v808_v5 = vld [vmem:[%s1231_s3 + $0x68] sm:$0xff]  ;;  %s654_s9 = sshll.u32 %s651_s7, 4  ;;  %s655_s9 = int_to_ptr.hbm [resolvable:$true] %s654_s9 }
  0x15   : > { %482 = vmatpush.bf16.msra.mxu1 %v810_v1  ;;  %820 = vmatpush.bf16.msra.mxu3 %v810_v1  ;;  %s1049_s25 = scalar_lea.vmem %s1228_s0, %s794_s14  ;;  %v253_v7 = vld [vmem:[%s1229_s1] sm:$0x3]  ;;  %v798_v22 = vld [vmem:[%s1231_s3 + $0x18] sm:$0xff]  ;;  %v797_v34 = vld [vmem:[%s1231_s3 + $0x10] sm:$0xff]  ;;  %s900_s10 = sshra.s32 %s655_s9, 4  ;;  %s901_s10 = int_to_ptr.hbm [resolvable:$true] %s900_s10 }
  0x16   : > { %v229_v6 = vld [vmem:[%s1049_s25] sm:$0xff]  ;;  %v230_v8 = vld [vmem:[%s1049_s25 + $0x8] sm:$0xff]  ;;  %v1067_v13 = vperm.slane %v253_v7, 0  ;;  %v1072_v21 = vperm.slane %v253_v7, 1  ;;  %v806_v25 = vld [vmem:[%s1231_s3 + $0x58] sm:$0xff]  ;;  %s902_s11 = scalar_lea.hbm %s901_s10, 64  ;;  %p907_p0 = scmp.lt.s32.totalorder %s901_s10, %s1233_s5 }
  0x17   : > { %v233_v9 = vld [vmem:[%s1049_s25 + $0x20] sm:$0xff]  ;;  %v234_v10 = vld [vmem:[%s1049_s25 + $0x28] sm:$0xff]  ;;  %v237_v14 = vunpack.c.l.bf16 %v229_v6  ;;  %v239_v15 = vunpack.c.l.bf16 %v230_v8  ;;  %v238_v19 = vunpack.c.h.bf16 %v229_v6  ;;  %v240_v20 = vunpack.c.h.bf16 %v230_v8  ;;  %v805_v37 = vld [vmem:[%s1231_s3 + $0x50] sm:$0xff]  ;;  %p903_p11 = scmp.ne.s32.totalorder %s901_s10, %s902_s11  ;;  %s906_s14 = scalar_lea.hbm %s1233_s5, 256 }
  0x18   : > { %454 = vmatpush.bf16.msra.mxu0 %v801_v2  ;;  %813 = vmatpush.bf16.msra.mxu2 %v801_v2  ;;  %v799_v11 = vld [vmem:[%s1231_s3 + $0x20] sm:$0xff]  ;;  %v245_v17 = vunpack.c.l.bf16 %v233_v9  ;;  %v247_v18 = vunpack.c.l.bf16 %v234_v10  ;;  %v246_v23 = vunpack.c.h.bf16 %v233_v9  ;;  %v248_v24 = vunpack.c.h.bf16 %v234_v10  ;;  %v796_v44 = vld [vmem:[%s1231_s3 + $0x8] sm:$0xff]  ;;  %v231_v54 = vld [vmem:[%s1049_s25 + $0x10] sm:$0xff]  ;;  %p908_p1 = scmp.lt.s32.totalorder %s906_s14, %s902_s11 }
  0x19   : > { %483 = vmatpush.bf16.msra.mxu1 %v809_v3  ;;  %821 = vmatpush.bf16.msra.mxu3 %v809_v3  ;;  %v807_v12 = vld [vmem:[%s1231_s3 + $0x60] sm:$0xff]  ;;  %v259_v27 = vmul.f32 %v1067_v13, %v237_v14  ;;  %v261_v28 = vmul.f32 %v1067_v13, %v239_v15  ;;  %v260_v31 = vmul.f32 %v1072_v21, %v238_v19  ;;  %v804_v47 = vld [vmem:[%s1231_s3 + $0x48] sm:$0xff]  ;;  %v232_v55 = vld [vmem:[%s1049_s25 + $0x18] sm:$0xff]  ;;  %v241_v0 = vunpack.c.l.bf16 %v231_v54  ;;  %p904_p12 = pnand %p903_p11, %p1020_p5 }
  0x1a   : > { %v275_v16 = vld [vmem:[%s1230_s2] sm:$0x3]  ;;  %v267_v29 = vmul.f32 %v1067_v13, %v245_v17  ;;  %v269_v30 = vmul.f32 %v1067_v13, %v247_v18  ;;  %v262_v32 = vmul.f32 %v1072_v21, %v240_v20  ;;  %v268_v35 = vmul.f32 %v1072_v21, %v246_v23  ;;  %v235_v59 = vld [vmem:[%s1049_s25 + $0x30] sm:$0xff]  ;;  %v236_v60 = vld [vmem:[%s1049_s25 + $0x38] sm:$0xff]  ;;  %p909_p2 = por %p908_p1, %p907_p0 }
  0x1b   : > { %v1080_v26 = vperm.slane %v275_v16, 0  ;;  %v1088_v33 = vperm.slane %v275_v16, 1  ;;  %v270_v36 = vmul.f32 %v1072_v21, %v248_v24  ;;  %v795_v56 = vld [vmem:[%s1231_s3] sm:$0xff]  ;;  %v243_v1 = vunpack.c.l.bf16 %v232_v55  ;;  %p905_p13 = pneg %p904_p12 }
  0x1c   : > { %455 = vmatpush.bf16.msra.mxu0 %v800_v4  ;;  %814 = vmatpush.bf16.msra.mxu2 %v800_v4  ;;  %v803_v61 = vld [vmem:[%s1231_s3 + $0x40] sm:$0xff]  ;;  %v249_v3 = vunpack.c.l.bf16 %v235_v59  ;;  %v251_v4 = vunpack.c.l.bf16 %v236_v60  ;;  %v244_v7 = vunpack.c.h.bf16 %v232_v55  ;;  %v250_v8 = vunpack.c.h.bf16 %v235_v59 }
  0x1d   : > { %484 = vmatpush.bf16.msra.mxu1 %v808_v5  ;;  %822 = vmatpush.bf16.msra.mxu3 %v808_v5  ;;  %v281_v38 = vadd.f32 %v1080_v26, %v259_v27  ;;  %v283_v39 = vadd.f32 %v1080_v26, %v261_v28  ;;  %v289_v40 = vadd.f32 %v1080_v26, %v267_v29  ;;  %v242_v5 = vunpack.c.h.bf16 %v231_v54  ;;  %p910_p3 = pnand %p909_p2, %p905_p13 }
  0x1e   : > { %v291_v41 = vadd.f32 %v1080_v26, %v269_v30  ;;  %v282_v42 = vadd.f32 %v1088_v33, %v260_v31  ;;  %v284_v43 = vadd.f32 %v1088_v33, %v262_v32  ;;  %v290_v45 = vadd.f32 %v1088_v33, %v268_v35 }
  0x1f   : > { %v292_v46 = vadd.f32 %v1088_v33, %v270_v36  ;;  %v297_v48 = vmax.f32 %v281_v38, 0.0  ;;  %v299_v49 = vmax.f32 %v283_v39, 0.0  ;;  %v305_v50 = vmax.f32 %v289_v40, 0.0 }
  0x20   : > { %456 = vmatpush.bf16.msra.mxu0 %v799_v11  ;;  %815 = vmatpush.bf16.msra.mxu2 %v799_v11  ;;  %v307_v51 = vmax.f32 %v291_v41, 0.0  ;;  %v298_v52 = vmax.f32 %v282_v42, 0.0  ;;  %v300_v53 = vmax.f32 %v284_v43, 0.0  ;;  %v306_v57 = vmax.f32 %v290_v45, 0.0 }
  0x21   : > { %485 = vmatpush.bf16.msra.mxu1 %v807_v12  ;;  %823 = vmatpush.bf16.msra.mxu3 %v807_v12  ;;  %v308_v58 = vmax.f32 %v292_v46, 0.0  ;;  %v313_v62 = vpack.c.bf16 %v299_v49, %v297_v48  ;;  %v252_v9 = vunpack.c.h.bf16 %v236_v60  ;;  %v263_v10 = vmul.f32 %v1067_v13, %v241_v0 }
  0x22   : > { %v317_v63 = vpack.c.bf16 %v307_v51, %v305_v50  ;;  %v314_v2 = vpack.c.bf16 %v300_v53, %v298_v52  ;;  %v265_v11 = vmul.f32 %v1067_v13, %v243_v1  ;;  %v271_v12 = vmul.f32 %v1067_v13, %v249_v3 }
  0x23   : > { %v318_v6 = vpack.c.bf16 %v308_v58, %v306_v57  ;;  %v273_v14 = vmul.f32 %v1067_v13, %v251_v4  ;;  %v264_v15 = vmul.f32 %v1072_v21, %v242_v5  ;;  %v266_v16 = vmul.f32 %v1072_v21, %v244_v7 }
  0x24   : > { %457 = vmatpush.bf16.msra.mxu0 %v798_v22  ;;  %816 = vmatpush.bf16.msra.mxu2 %v798_v22  ;;  %v272_v17 = vmul.f32 %v1072_v21, %v250_v8  ;;  %v274_v18 = vmul.f32 %v1072_v21, %v252_v9  ;;  %v285_v19 = vadd.f32 %v1080_v26, %v263_v10 }
  0x25   : > { %486 = vmatpush.bf16.msra.mxu1 %v806_v25  ;;  %824 = vmatpush.bf16.msra.mxu3 %v806_v25  ;;  %v287_v20 = vadd.f32 %v1080_v26, %v265_v11  ;;  %v293_v22 = vadd.f32 %v1080_v26, %v271_v12  ;;  %v295_v23 = vadd.f32 %v1080_v26, %v273_v14 }
  0x26   : > { %v286_v13 = vadd.f32 %v1088_v33, %v264_v15  ;;  %v288_v24 = vadd.f32 %v1088_v33, %v266_v16  ;;  %v294_v25 = vadd.f32 %v1088_v33, %v272_v17  ;;  %v296_v27 = vadd.f32 %v1088_v33, %v274_v18  ;;  %v869_v33 = vld [vmem:[%s1232_s4] ss:$0 sm:$0xff] }
  0x27   : > { %v301_v28 = vmax.f32 %v285_v19, 0.0  ;;  %v303_v29 = vmax.f32 %v287_v20, 0.0  ;;  %v309_v30 = vmax.f32 %v293_v22, 0.0  ;;  %v311_v21 = vmax.f32 %v295_v23, 0.0 }
  0x28   : > { %458 = vmatpush.bf16.msra.mxu0 %v797_v34  ;;  %817 = vmatpush.bf16.msra.mxu2 %v797_v34  ;;  %v302_v31 = vmax.f32 %v286_v13, 0.0  ;;  %v304_v32 = vmax.f32 %v288_v24, 0.0  ;;  %v310_v34 = vmax.f32 %v294_v25, 0.0  ;;  %v312_v35 = vmax.f32 %v296_v27, 0.0 }
  0x29   : > { %487 = vmatpush.bf16.msra.mxu1 %v805_v37  ;;  %825 = vmatpush.bf16.msra.mxu3 %v805_v37  ;;  %v315_v36 = vpack.c.bf16 %v303_v29, %v301_v28  ;;  %v319_v37 = vpack.c.bf16 %v311_v21, %v309_v30 }
  0x2a   : > { %v316_v38 = vpack.c.bf16 %v304_v32, %v302_v31  ;;  %v320_v26 = vpack.c.bf16 %v312_v35, %v310_v34 }
  0x2c   : > { %459 = vmatpush.bf16.msra.mxu0 %v796_v44  ;;  %818 = vmatpush.bf16.msra.mxu2 %v796_v44 }
  0x2d   : > { %488 = vmatpush.bf16.msra.mxu1 %v804_v47  ;;  %826 = vmatpush.bf16.msra.mxu3 %v804_v47 }
  0x30   : > { %460 = vmatpush.bf16.msra.mxu0 %v795_v56  ;;  %819 = vmatpush.bf16.msra.mxu2 %v795_v56 }
  0x31   : > { %489 = vmatpush.bf16.msra.mxu1 %v803_v61  ;;  %827 = vmatpush.bf16.msra.mxu3 %v803_v61 }
  0x33   : > { %461 = vmatmul.bf16.vlgmr.msra.gmra.mxu0 %v313_v62  ;;  %471 = vmatmul.bf16.vlgmr.msra.gmra.mxu2 %v317_v63 }
  0x34   : > { %490 = vmatmul.bf16.vlgmr.msra.gmra.mxu1 %v314_v2  ;;  %500 = vmatmul.bf16.vlgmr.msra.gmra.mxu3 %v318_v6 }
  0x43   : > { %466 = vmatmul.bf16.gmra.mxu0 %v315_v36  ;;  %476 = vmatmul.bf16.gmra.mxu2 %v319_v37 }
  0x44   : > { %495 = vmatmul.bf16.gmra.mxu1 %v316_v38  ;;  %505 = vmatmul.bf16.gmra.mxu3 %v320_v26 }
  0xb0   : > { %v462_v39 = vpop.f32.mrf.mxu0 }
  0xb1   : > { %v463_v40 = vadd.f32 %v869_v33, %v462_v39  ;;  %v491_v41 = vpop.f32.mrf.mxu1 }
  0xb3   : > { %v1141_v42 = vadd.f32 %v491_v41, %v463_v40 }
  0xb5   : > { %v511_v43 = vmul.f32 %v1141_v42, %v1141_v42 }
  0xb6   : > { %v472_v44 = vpop.f32.mrf.mxu2 }
  0xb7   : > { %v473_v45 = vadd.f32 %v869_v33, %v472_v44  ;;  %v501_v46 = vpop.f32.mrf.mxu3  ;;  %519 = vadd.xlane.f32.xlu0 %v511_v43 }
  0xb8   : > { %v464_v47 = vpop.f32.mrf.mxu0 }
  0xb9   : > { %v1145_v48 = vadd.f32 %v501_v46, %v473_v45  ;;  %v465_v49 = vadd.f32 %v869_v33, %v464_v47  ;;  %v493_v50 = vpop.f32.mrf.mxu1 }
  0xbb   : > { %v1147_v51 = vadd.f32 %v493_v50, %v465_v49  ;;  %v515_v52 = vmul.f32 %v1145_v48, %v1145_v48 }
  0xbd   : > { %527 = vadd.xlane.f32.xlu2 %v515_v52  ;;  %v512_v53 = vmul.f32 %v1147_v51, %v1147_v51 }
  0xbe   : > { %v474_v54 = vpop.f32.mrf.mxu2 }
  0xbf   : > { %v475_v55 = vadd.f32 %v869_v33, %v474_v54  ;;  %v503_v56 = vpop.f32.mrf.mxu3  ;;  %521 = vadd.xlane.f32.xlu0 %v512_v53 }
  0xc0   : > { %v467_v57 = vpop.f32.mrf.mxu0 }
  0xc1   : > { %v1153_v58 = vadd.f32 %v503_v56, %v475_v55  ;;  %v468_v59 = vadd.f32 %v869_v33, %v467_v57  ;;  %v496_v60 = vpop.f32.mrf.mxu1 }
  0xc3   : > { %v1155_v61 = vadd.f32 %v496_v60, %v468_v59  ;;  %v516_v62 = vmul.f32 %v1153_v58, %v1153_v58 }
  0xc5   : > { %529 = vadd.xlane.f32.xlu2 %v516_v62  ;;  %v513_v63 = vmul.f32 %v1155_v61, %v1155_v61 }
  0xc6   : > { %v477_v0 = vpop.f32.mrf.mxu2 }
  0xc7   : > { %v478_v1 = vadd.f32 %v869_v33, %v477_v0  ;;  %v506_v2 = vpop.f32.mrf.mxu3  ;;  %523 = vadd.xlane.f32.xlu1 %v513_v63 }
  0xc8   : > { %v469_v3 = vpop.f32.mrf.mxu0 }
  0xc9   : > { %v1161_v4 = vadd.f32 %v506_v2, %v478_v1  ;;  %v470_v5 = vadd.f32 %v869_v33, %v469_v3  ;;  %v498_v6 = vpop.f32.mrf.mxu1 }
  0xcb   : > { %v1163_v7 = vadd.f32 %v498_v6, %v470_v5  ;;  %v517_v8 = vmul.f32 %v1161_v4, %v1161_v4 }
  0xcd   : > { %531 = vadd.xlane.f32.xlu0 %v517_v8  ;;  %v514_v9 = vmul.f32 %v1163_v7, %v1163_v7 }
  0xce   : > { %v479_v10 = vpop.f32.mrf.mxu2 }
  0xcf   : > { %v480_v11 = vadd.f32 %v869_v33, %v479_v10  ;;  %525 = vadd.xlane.f32.xlu1 %v514_v9  ;;  %v508_v12 = vpop.f32.mrf.mxu3 }
  0xd1   : > { %v1169_v14 = vadd.f32 %v508_v12, %v480_v11 }
  0xd3   : > { %v518_v15 = vmul.f32 %v1169_v14, %v1169_v14 }
  0xd7   : > { %533 = vadd.xlane.f32.xlu1 %v518_v15 }
 0x12a   : > { %v520_v16 = vpop.xlane.xlu0 %519 }
 0x12b   : > { %v535_v17 = vmax.f32 %v520_v16, 1e-24 }
 0x12d   : > { %870 = vrsqrt.f32 %v535_v17  ;;  %vm549_vm1 = vweird.f32 %v535_v17 }
 0x130   : > { %v528_v18 = vpop.xlane.xlu2 %527 }
 0x131   : > { %v539_v19 = vmax.f32 %v528_v18, 1e-24 }
 0x132   : > { %v522_v20 = vpop.xlane.xlu0 %521 }
 0x133   : > { %v871_v22 = vpop.eup %870  ;;  %872 = vrsqrt.f32 %v539_v19  ;;  %v536_v23 = vmax.f32 %v522_v20, 1e-24  ;;  %vm589_vm4 = vweird.f32 %v539_v19 }
 0x134   : > { %v544_v13 = vmul.f32 %v871_v22, %v535_v17  ;;  %vm550_vm0 = vweird.f32 %v871_v22 }
 0x135   : > { %874 = vrsqrt.f32 %v536_v23  ;;  %vm551_vm2 = vmor %vm549_vm1, %vm550_vm0  ;;  %vm559_vm7 = vweird.f32 %v536_v23 }
 0x136   : > { %v545_v24 = vmul.f32 %v871_v22, %v544_v13 }
 0x138   : > { %v546_v25 = vmul.f32 0.5, %v545_v24  ;;  %v530_v27 = vpop.xlane.xlu2 %529 }
 0x139   : > { %v873_v28 = vpop.eup %872  ;;  %v540_v29 = vmax.f32 %v530_v27, 1e-24 }
 0x13a   : > { %v547_v30 = vsub.f32 1.5, %v546_v25  ;;  %v584_v21 = vmul.f32 %v873_v28, %v539_v19  ;;  %v524_v31 = vpop.xlane.xlu1 %523  ;;  %vm590_vm3 = vweird.f32 %v873_v28 }
 0x13b   : > { %v875_v32 = vpop.eup %874  ;;  %876 = vrsqrt.f32 %v540_v29  ;;  %v537_v34 = vmax.f32 %v524_v31, 1e-24  ;;  %vm591_vm6 = vmor %vm589_vm4, %vm590_vm3  ;;  %vm599_vm10 = vweird.f32 %v540_v29 }
 0x13c   : > { %v548_v35 = vmul.f32 %v871_v22, %v547_v30  ;;  %v585_v36 = vmul.f32 %v873_v28, %v584_v21  ;;  %v554_v37 = vmul.f32 %v875_v32, %v536_v23  ;;  %vm560_vm5 = vweird.f32 %v875_v32 }
 0x13d   : > { %878 = vrsqrt.f32 %v537_v34  ;;  %vm561_vm8 = vmor %vm559_vm7, %vm560_vm5  ;;  %vm569_vm13 = vweird.f32 %v537_v34 }
 0x13e   : > { %v552_v38 = vsel %vm551_vm2, %v871_v22, %v548_v35  ;;  %v586_v26 = vmul.f32 0.5, %v585_v36  ;;  %v555_v33 = vmul.f32 %v875_v32, %v554_v37 }
 0x13f   : > { %v623_v39 = vmul.f32 %v552_v38, %v1141_v42 }
 0x140   : > { %v587_v40 = vsub.f32 1.5, %v586_v26  ;;  %v556_v41 = vmul.f32 0.5, %v555_v33  ;;  %v532_v43 = vpop.xlane.xlu0 %531 }
 0x141   : > { %v877_v44 = vpop.eup %876  ;;  %631 = vst [vmem:[%s1177_s23] sm:$0xff] %v623_v39  ;;  %v541_v45 = vmax.f32 %v532_v43, 1e-24 }
 0x142   : > { %v588_v46 = vmul.f32 %v873_v28, %v587_v40  ;;  %v557_v47 = vsub.f32 1.5, %v556_v41  ;;  %v594_v49 = vmul.f32 %v877_v44, %v540_v29  ;;  %v526_v50 = vpop.xlane.xlu1 %525  ;;  %vm600_vm9 = vweird.f32 %v877_v44 }
 0x143   : > { %v879_v52 = vpop.eup %878  ;;  %880 = vrsqrt.f32 %v541_v45  ;;  %v538_v42 = vmax.f32 %v526_v50, 1e-24  ;;  %vm601_vm12 = vmor %vm599_vm10, %vm600_vm9  ;;  %vm609_vm0 = vweird.f32 %v541_v45 }
 0x144   : > { %v592_v53 = vsel %vm591_vm6, %v873_v28, %v588_v46  ;;  %v558_v54 = vmul.f32 %v875_v32, %v557_v47  ;;  %v595_v55 = vmul.f32 %v877_v44, %v594_v49  ;;  %v564_v56 = vmul.f32 %v879_v52, %v537_v34 }
 0x145   : > { %v627_v57 = vmul.f32 %v592_v53, %v1145_v48  ;;  %882 = vrsqrt.f32 %v538_v42  ;;  %vm570_vm11 = vweird.f32 %v879_v52  ;;  %vm579_vm3 = vweird.f32 %v538_v42 }
 0x146   : > { %v562_v59 = vsel %vm561_vm8, %v875_v32, %v558_v54  ;;  %v596_v60 = vmul.f32 0.5, %v595_v55  ;;  %v565_v62 = vmul.f32 %v879_v52, %v564_v56  ;;  %vm571_vm14 = vmor %vm569_vm13, %vm570_vm11 }
 0x147   : > { %635 = vst [vmem:[%s1177_s23 + $0x20] sm:$0xff] %v627_v57  ;;  %v624_v63 = vmul.f32 %v562_v59, %v1147_v51 }
 0x148   : > { %v597_v0 = vsub.f32 1.5, %v596_v60  ;;  %v566_v1 = vmul.f32 0.5, %v565_v62 }
 0x149   : > { %v881_v2 = vpop.eup %880  ;;  %632 = vst [vmem:[%s1177_s23 + $0x8] sm:$0xff] %v624_v63 }
 0x14a   : > { %v598_v3 = vmul.f32 %v877_v44, %v597_v0  ;;  %v567_v5 = vsub.f32 1.5, %v566_v1  ;;  %v604_v6 = vmul.f32 %v881_v2, %v541_v45  ;;  %v534_v48 = vpop.xlane.xlu1 %533  ;;  %vm610_vm15 = vweird.f32 %v881_v2 }
 0x14b   : > { %v883_v8 = vpop.eup %882  ;;  %v542_v9 = vmax.f32 %v534_v48, 1e-24  ;;  %vm611_vm2 = vmor %vm609_vm0, %vm610_vm15 }
 0x14c   : > { %v602_v10 = vsel %vm601_vm12, %v877_v44, %v598_v3  ;;  %v568_v11 = vmul.f32 %v879_v52, %v567_v5  ;;  %v605_v51 = vmul.f32 %v881_v2, %v604_v6  ;;  %v574_v12 = vmul.f32 %v883_v8, %v538_v42 }
 0x14d   : > { %v628_v15 = vmul.f32 %v602_v10, %v1153_v58  ;;  %884 = vrsqrt.f32 %v542_v9  ;;  %vm580_vm1 = vweird.f32 %v883_v8  ;;  %vm619_vm6 = vweird.f32 %v542_v9 }
 0x14e   : > { %v572_v16 = vsel %vm571_vm14, %v879_v52, %v568_v11  ;;  %v606_v17 = vmul.f32 0.5, %v605_v51  ;;  %v575_v18 = vmul.f32 %v883_v8, %v574_v12  ;;  %vm581_vm4 = vmor %vm579_vm3, %vm580_vm1 }
 0x14f   : > { %636 = vst [vmem:[%s1177_s23 + $0x28] sm:$0xff] %v628_v15  ;;  %v625_v19 = vmul.f32 %v572_v16, %v1155_v61 }
 0x150   : > { %v607_v20 = vsub.f32 1.5, %v606_v17  ;;  %v576_v22 = vmul.f32 0.5, %v575_v18 }
 0x151   : > { %633 = vst [vmem:[%s1177_s23 + $0x10] sm:$0xff] %v625_v19 }
 0x152   : > { %v608_v23 = vmul.f32 %v881_v2, %v607_v20  ;;  %v577_v13 = vsub.f32 1.5, %v576_v22 }
 0x153   : > { %v885_v58 = vpop.eup %884 }
 0x154   : > { %v612_v24 = vsel %vm611_vm2, %v881_v2, %v608_v23  ;;  %v578_v25 = vmul.f32 %v883_v8, %v577_v13  ;;  %v614_v27 = vmul.f32 %v885_v58, %v542_v9  ;;  %vm620_vm5 = vweird.f32 %v885_v58 }
 0x155   : > { %v629_v61 = vmul.f32 %v612_v24, %v1161_v4  ;;  %vm621_vm7 = vmor %vm619_vm6, %vm620_vm5 }
 0x156   : > { %v582_v28 = vsel %vm581_vm4, %v883_v8, %v578_v25  ;;  %v615_v29 = vmul.f32 %v885_v58, %v614_v27 }
 0x157   : > { %637 = vst [vmem:[%s1177_s23 + $0x30] sm:$0xff] %v629_v61  ;;  %v626_v30 = vmul.f32 %v582_v28, %v1163_v7 }
 0x158   : > { %v616_v21 = vmul.f32 0.5, %v615_v29 }
 0x159   : > { %634 = vst [vmem:[%s1177_s23 + $0x18] sm:$0xff] %v626_v30 }
 0x15a   : > { %v617_v31 = vsub.f32 1.5, %v616_v21 }
 0x15c   : > { %v618_v4 = vmul.f32 %v885_v58, %v617_v31 }
 0x15e   : > { %v622_v32 = vsel %vm621_vm7, %v885_v58, %v618_v4 }
 0x15f   : > { %v630_v7 = vmul.f32 %v622_v32, %v1169_v14 }
 0x161   : > { %638 = vst [vmem:[%s1177_s23 + $0x38] sm:$0xff] %v630_v7 }
 0x162   : > { %913 = shalt.err (!%p910_p3)
}
 0x163   : > { %s950_s16 = smov 128   ;;  %s951_s17 = smov 8  }
 0x164   : > { %828 = dma.vmem_to_hbm [thread:$0]  (%p1020_p5), %s653_s8, 1024, %s655_s9, %s640_s22, %s950_s16, %s950_s16, %s951_s17  }
 0x165 PF: > { %p834_p4 = scmp.ge.s32.totalorder %s948_s21, 2  ;;  %s669_s23 = sand.u32 1, %s936_s18  }
 0x166   : > { %s670_s26 = scalar_lea.sflag [#allocation3], %s669_s23 }
 0x167   : > { %p831_p7 = pnand %p834_p4, %p1024_p6 }
 0x169   : > { %p832_p8 = pneg %p831_p7 }
 0x16b   : > { %931 = dma.done.wait (%p832_p8), %s670_s26, 1024  }
 0x16c   : > { %933 = vsyncadd (%p832_p8), %s670_s26, 4294966272  ;;  %p15_p9 = scmp.ge.s32.totalorder %s1007_s24, 6   ;;  %s1236_s18 = smov %s940_s19 }
 0x16d   : > { %s1237_s19 = smov %s944_s20  ;;  %s1238_s20 = smov %s1018_s27 }
 0x16e   : > { %s1239_s21 = smov %s1007_s24  ;;  %17 = sbr.rel (!%p15_p9) target bundleno = 3 (0x3), region = 75 }
 0x173   :  { %676 = vsyncpa [#allocation3], 1 }
 0x174   :  { %678 = vsyncpa [#allocation3 + $0x1], 1 }

</bundles_post_ra>
